<compile_context>
chip_gen: v5e
topology: v5e:2x2
jax: 0.10.0
libtpu: 0.0.40
codegen_flags: <defaults>
</compile_context>

<pallas_src>
import functools

import jax
import jax.numpy as jnp
from jax import lax
from jax.experimental import pallas as pl
from jax.experimental.pallas import tpu as pltpu


def basic_block_kernel(x_ref, cid_ref, s1_ref, b1_ref, w1_ref, s2_ref, b2_ref, w2_ref,
                       out_ref, pad_ref, col_ref, *, H, W, OFF, B):
    # x_ref   : (B, C, H*W)  B images, flat NCHW (lane dim = H*W, dense)
    # cid_ref : (1, H*W)     int32 column index (pixel % W) -> edge masks built in-kernel
    # s*/b*   : (C, 1) f32   folded BN scale/shift (broadcast in-kernel)
    # w*_ref  : (C, 9*C)     conv weights, bf16, element [co, (ky*3+kx)*C + ci]
    # out_ref : (B, C, H*W)
    # pad_ref : VMEM (B*C, OFF + H*W + W + 1) bf16  -- flat images with zero halos
    # col_ref : VMEM (9*C, B*H*W) bf16              -- im2col matrix (reused by both convs)
    C = w1_ref.shape[0]
    HW = H * W

    # Horizontal edge masks (row-wrapped columns of the flat image), hoisted once.
    cid = cid_ref[...]                                        # (1, HW) int32
    not_left = jnp.broadcast_to(cid != 0, (C, HW))
    not_right = jnp.broadcast_to(cid != (W - 1), (C, HW))

    # Zero only the reachable halo, once per grid step, for all B images at once.
    # (Interior is fully overwritten before each conv; the halo is never written again.
    #  Kept per-step and un-gated: scratch is per-core under "parallel" grid semantics.)
    zhalo = jnp.zeros((B * C, W + 1), pad_ref.dtype)
    pad_ref[:, OFF - (W + 1):OFF] = zhalo
    pad_ref[:, OFF + HW:OFF + HW + W + 1] = zhalo

    def conv3x3(get_img, w_ref):
        # get_img(b) -> (C, HW) bf16 interior of image b (already cast once, outside).
        for b in range(B):
            pad_ref[b * C:(b + 1) * C, OFF:OFF + HW] = get_img(b)
        # Build the (9C, B*HW) im2col matrix: each tap is a lane-offset read of the
        # flat padded image; row-wrapped edge columns are zeroed with a select
        # (no bf16 multiplies -> safe on v5e's f32-only VPU).
        for k in range(9):
            ky, kx = divmod(k, 3)
            d = (ky - 1) * W + (kx - 1)
            for b in range(B):
                slab = pad_ref[b * C:(b + 1) * C, OFF + d:OFF + d + HW]   # (C, HW) bf16
                if kx == 0:
                    slab = jnp.where(not_left, slab, jnp.zeros_like(slab))
                elif kx == 2:
                    slab = jnp.where(not_right, slab, jnp.zeros_like(slab))
                col_ref[k * C:(k + 1) * C, b * HW:(b + 1) * HW] = slab
        # Single fused MXU matmul per conv: bf16 operands, f32 accumulation.
        return jnp.dot(w_ref[...], col_ref[...],
                       preferred_element_type=jnp.float32)    # (C, B*HW) f32

    # BN1 + ReLU (+ dropout identity) on the whole (B, C, HW) block, f32 math.
    s1 = s1_ref[...][None]                                    # (1, C, 1)
    b1 = b1_ref[...][None]
    t1 = jnp.maximum(x_ref[...].astype(jnp.float32) * s1 + b1, 0.0)
    t1b = t1.astype(pad_ref.dtype)                            # one f32->bf16 cast

    y1 = conv3x3(lambda b: t1b[b], w1_ref)                    # conv1 -> (C, B*HW)

    # BN2 + ReLU (+ dropout identity), stays in lane-dense (C, B*HW) layout.
    t2 = jnp.maximum(y1 * s2_ref[...] + b2_ref[...], 0.0)     # (C,1) broadcasts
    t2b = t2.astype(pad_ref.dtype)

    y2 = conv3x3(lambda b: t2b[:, b * HW:(b + 1) * HW], w2_ref)   # conv2 -> (C, B*HW)

    # Residual add + dense, lane-aligned output stores.
    for b in range(B):
        out_ref[b] = (y2[:, b * HW:(b + 1) * HW]
                      + x_ref[b].astype(jnp.float32)).astype(out_ref.dtype)


@jax.jit
def basic_block(x_nchw, scale1, shift1, w1_oihw, scale2, shift2, w2_oihw):
    """x_nchw: (N,C,H,W); scale/shift: (C,); w: (C,C,3,3) OIHW.  Returns (N,C,H,W)."""
    N, C, H, W = x_nchw.shape
    HW = H * W
    assert w1_oihw.shape == (C, C, 3, 3) and w2_oihw.shape == (C, C, 3, 3), (
        "residual BasicBlock path requires inplanes == planes and stride == 1")

    # Images stacked per grid step: widen the matmul / amortize per-step overhead while
    # keeping >= 2 grid steps when possible so both v7x TensorCores get work.
    B = N // 2 if (N >= 2 and N % 2 == 0) else 1
    B = max(1, min(B, max(1, 4096 // HW)))      # keep col_ref lane width modest
    while N % B:
        B -= 1
    G = N // B

    OFF = ((W + 1 + 127) // 128) * 128          # 128-aligned interior lane offset
    PADW = OFF + HW + W + 1

    x2 = x_nchw.reshape(N, C, HW)
    colidx = (jnp.arange(HW, dtype=jnp.int32) % W).reshape(1, HW)

    def per_chan(v):                            # (C,) -> (C, 1) f32; broadcast in-kernel
        return v.astype(jnp.float32).reshape(C, 1)

    def wmat(w_oihw):                           # OIHW -> (C_out, 9*C_in) bf16 for the MXU
        return jnp.transpose(w_oihw, (0, 2, 3, 1)).reshape(C, 9 * C).astype(jnp.bfloat16)

    img_spec = pl.BlockSpec((B, C, HW), lambda g: (g, 0, 0))
    cid_spec = pl.BlockSpec((1, HW), lambda g: (0, 0))
    vec_spec = pl.BlockSpec((C, 1), lambda g: (0, 0))
    w_spec = pl.BlockSpec((C, 9 * C), lambda g: (0, 0))

    out = pl.pallas_call(
        functools.partial(basic_block_kernel, H=H, W=W, OFF=OFF, B=B),
        out_shape=jax.ShapeDtypeStruct((N, C, HW), x_nchw.dtype),
        grid_spec=pltpu.PrefetchScalarGridSpec(
            num_scalar_prefetch=0,
            grid=(G,),
            in_specs=[img_spec, cid_spec, vec_spec, vec_spec, w_spec,
                      vec_spec, vec_spec, w_spec],
            out_specs=img_spec,
            scratch_shapes=[
                pltpu.VMEM((B * C, PADW), jnp.bfloat16),
                pltpu.VMEM((9 * C, B * HW), jnp.bfloat16),
            ],
        ),
        compiler_params=pltpu.CompilerParams(
            dimension_semantics=("parallel",)),
    )(x2, colidx, per_chan(scale1), per_chan(shift1), wmat(w1_oihw),
      per_chan(scale2), per_chan(shift2), wmat(w2_oihw))
    return out.reshape(N, C, H, W)


def reference_block(x, s1, b1, w1_oihw, s2, b2, w2_oihw):
    # Eval-mode pre-activation BasicBlock in NCHW; conv operands cast to bf16 like the
    # kernel (f32 accumulation) so the comparison is tight.
    def bn(v, s, b):
        return v * s.reshape(1, -1, 1, 1) + b.reshape(1, -1, 1, 1)

    def conv(v, w):
        return lax.conv_general_dilated(
            v.astype(jnp.bfloat16), w.astype(jnp.bfloat16), (1, 1), "SAME",
            dimension_numbers=("NCHW", "OIHW", "NCHW"),
            preferred_element_type=jnp.float32)

    t = jax.nn.relu(bn(x, s1, b1))
    y = conv(t, w1_oihw)
    t2 = jax.nn.relu(bn(y, s2, b2))
    return conv(t2, w2_oihw) + x


def fold_bn(gamma, beta, mean, var, eps=1e-5):
    scale = gamma / jnp.sqrt(var + eps)
    shift = beta - mean * scale
    return scale, shift


if __name__ == "__main__":
    # Module hyperparameters (inplanes == planes, stride=1, downsample=None).
    N, C, Hs, Ws = 4, 16, 16, 16          # PyTorch input NCHW = (4, 16, 16, 16)

    key = jax.random.PRNGKey(0)
    ks = jax.random.split(key, 11)

    x = jax.random.normal(ks[0], (N, C, Hs, Ws), dtype=jnp.float32)   # NCHW, PyTorch layout

    # BatchNorm2d(inplanes) parameters + running stats.
    g1 = 0.5 + jax.random.uniform(ks[1], (C,), dtype=jnp.float32)
    b1 = 0.1 * jax.random.normal(ks[2], (C,), dtype=jnp.float32)
    m1 = 0.1 * jax.random.normal(ks[3], (C,), dtype=jnp.float32)
    v1 = 0.5 + jax.random.uniform(ks[4], (C,), dtype=jnp.float32)
    # BatchNorm2d(planes)
    g2 = 0.5 + jax.random.uniform(ks[5], (C,), dtype=jnp.float32)
    b2 = 0.1 * jax.random.normal(ks[6], (C,), dtype=jnp.float32)
    m2 = 0.1 * jax.random.normal(ks[7], (C,), dtype=jnp.float32)
    v2 = 0.5 + jax.random.uniform(ks[8], (C,), dtype=jnp.float32)

    # conv3x3 weights (PyTorch OIHW layout), Kaiming-ish scale.
    std = (2.0 / (9 * C)) ** 0.5
    w1_oihw = std * jax.random.normal(ks[9], (C, C, 3, 3), dtype=jnp.float32)
    w2_oihw = std * jax.random.normal(ks[10], (C, C, 3, 3), dtype=jnp.float32)

    s1, sh1 = fold_bn(g1, b1, m1, v1)
    s2, sh2 = fold_bn(g2, b2, m2, v2)

    out = basic_block(x, s1, sh1, w1_oihw, s2, sh2, w2_oihw)
    out = jax.block_until_ready(out)

    ref = reference_block(x, s1, sh1, w1_oihw, s2, sh2, w2_oihw)
    err = jnp.max(jnp.abs(out - ref))
    assert jnp.allclose(out, ref, atol=1e-2, rtol=1e-2), f"max err {err}"

    print("KERNEL_OK")
</pallas_src>

<mosaic_0001>
module attributes {stable_mosaic.version = 11 : i64} {
  func.func @basic_block_kernel(%arg0: i32, %arg1: memref<2x16x256xf32, #tpu.memory_space<vmem>>, %arg2: memref<1x256xi32, #tpu.memory_space<vmem>>, %arg3: memref<16x1xf32, #tpu.memory_space<vmem>>, %arg4: memref<16x1xf32, #tpu.memory_space<vmem>>, %arg5: memref<16x144xbf16, #tpu.memory_space<vmem>>, %arg6: memref<16x1xf32, #tpu.memory_space<vmem>>, %arg7: memref<16x1xf32, #tpu.memory_space<vmem>>, %arg8: memref<16x144xbf16, #tpu.memory_space<vmem>>, %arg9: memref<2x16x256xf32, #tpu.memory_space<vmem>>, %arg10: memref<32x401xbf16, #tpu.memory_space<vmem>>, %arg11: memref<144x512xbf16, #tpu.memory_space<vmem>>) attributes {dimension_semantics = [#tpu.dimension_semantics<parallel>], iteration_bounds = array<i64: 2>, scalar_prefetch = 0 : i64, scratch_operands = 2 : i64, tpu.core_type = #tpu.core_type<tc>, window_params = [{transform_indices = @transform_0, window_bounds = array<i64: 2, 16, 256>}, {pipeline_mode = #tpu.pipeline_mode<synchronous>, transform_indices = @transform_1, window_bounds = array<i64: 1, 256>}, {pipeline_mode = #tpu.pipeline_mode<synchronous>, transform_indices = @transform_2, window_bounds = array<i64: 16, 1>}, {pipeline_mode = #tpu.pipeline_mode<synchronous>, transform_indices = @transform_3, window_bounds = array<i64: 16, 1>}, {pipeline_mode = #tpu.pipeline_mode<synchronous>, transform_indices = @transform_4, window_bounds = array<i64: 16, 144>}, {pipeline_mode = #tpu.pipeline_mode<synchronous>, transform_indices = @transform_5, window_bounds = array<i64: 16, 1>}, {pipeline_mode = #tpu.pipeline_mode<synchronous>, transform_indices = @transform_6, window_bounds = array<i64: 16, 1>}, {pipeline_mode = #tpu.pipeline_mode<synchronous>, transform_indices = @transform_7, window_bounds = array<i64: 16, 144>}, {transform_indices = @transform_8, window_bounds = array<i64: 2, 16, 256>}]} {
    %c0 = arith.constant 0 : index
    %c0_0 = arith.constant 0 : index
    %0 = vector.load %arg2[%c0, %c0_0] : memref<1x256xi32, #tpu.memory_space<vmem>>, vector<1x256xi32>
    %c0_i32 = arith.constant 0 : i32
    %1 = vector.broadcast %c0_i32 : i32 to vector<1x256xi32>
    %2 = arith.cmpi ne, %0, %1 : vector<1x256xi32>
    %3 = vector.shape_cast %2 : vector<1x256xi1> to vector<1x256xi1>
    %4 = vector.broadcast %3 : vector<1x256xi1> to vector<16x256xi1>
    %c15_i32 = arith.constant 15 : i32
    %5 = vector.broadcast %c15_i32 : i32 to vector<1x256xi32>
    %6 = arith.cmpi ne, %0, %5 : vector<1x256xi32>
    %7 = vector.shape_cast %6 : vector<1x256xi1> to vector<1x256xi1>
    %8 = vector.broadcast %7 : vector<1x256xi1> to vector<16x256xi1>
    %cst = arith.constant 0.000000e+00 : bf16
    %9 = vector.broadcast %cst : bf16 to vector<32x17xbf16>
    %c0_1 = arith.constant 0 : index
    %c111 = arith.constant 111 : index
    %10 = vector.load %arg10[%c0_1, %c111] : memref<32x401xbf16, #tpu.memory_space<vmem>>, vector<32x17xbf16>
    tpu.vector_store %arg10[%c0_1, %c111], %9 {strides = array<i32>} : memref<32x401xbf16, #tpu.memory_space<vmem>>, vector<32x17xbf16>,
    %c0_2 = arith.constant 0 : index
    %c384 = arith.constant 384 : index
    %11 = vector.load %arg10[%c0_2, %c384] : memref<32x401xbf16, #tpu.memory_space<vmem>>, vector<32x17xbf16>
    tpu.vector_store %arg10[%c0_2, %c384], %9 {strides = array<i32>} : memref<32x401xbf16, #tpu.memory_space<vmem>>, vector<32x17xbf16>,
    %c0_3 = arith.constant 0 : index
    %c0_4 = arith.constant 0 : index
    %12 = vector.load %arg3[%c0_3, %c0_4] : memref<16x1xf32, #tpu.memory_space<vmem>>, vector<16x1xf32>
    %13 = vector.shape_cast %12 : vector<16x1xf32> to vector<1x16x1xf32>
    %c0_5 = arith.constant 0 : index
    %c0_6 = arith.constant 0 : index
    %14 = vector.load %arg4[%c0_5, %c0_6] : memref<16x1xf32, #tpu.memory_space<vmem>>, vector<16x1xf32>
    %15 = vector.shape_cast %14 : vector<16x1xf32> to vector<1x16x1xf32>
    %c0_7 = arith.constant 0 : index
    %c0_8 = arith.constant 0 : index
    %c0_9 = arith.constant 0 : index
    %16 = vector.load %arg1[%c0_7, %c0_8, %c0_9] : memref<2x16x256xf32, #tpu.memory_space<vmem>>, vector<2x16x256xf32>
    %17 = vector.broadcast %13 : vector<1x16x1xf32> to vector<2x16x256xf32>
    %18 = arith.mulf %16, %17 : vector<2x16x256xf32>
    %19 = vector.broadcast %15 : vector<1x16x1xf32> to vector<2x16x256xf32>
    %20 = arith.addf %18, %19 : vector<2x16x256xf32>
    %cst_10 = arith.constant 0.000000e+00 : f32
    %21 = vector.broadcast %cst_10 : f32 to vector<2x16x256xf32>
    %22 = arith.maximumf %20, %21 : vector<2x16x256xf32>
    %23 = arith.truncf %22 : vector<2x16x256xf32> to vector<2x16x256xbf16>
    %24 = vector.extract_strided_slice %23 {offsets = [0, 0, 0], sizes = [1, 16, 256], strides = [1, 1, 1]} : vector<2x16x256xbf16> to vector<1x16x256xbf16>
    %25 = vector.shape_cast %24 : vector<1x16x256xbf16> to vector<16x256xbf16>
    %c0_11 = arith.constant 0 : index
    %c128 = arith.constant 128 : index
    %26 = vector.load %arg10[%c0_11, %c128] : memref<32x401xbf16, #tpu.memory_space<vmem>>, vector<16x256xbf16>
    tpu.vector_store %arg10[%c0_11, %c128], %25 {strides = array<i32>} : memref<32x401xbf16, #tpu.memory_space<vmem>>, vector<16x256xbf16>,
    %27 = vector.extract_strided_slice %23 {offsets = [1, 0, 0], sizes = [1, 16, 256], strides = [1, 1, 1]} : vector<2x16x256xbf16> to vector<1x16x256xbf16>
    %28 = vector.shape_cast %27 : vector<1x16x256xbf16> to vector<16x256xbf16>
    %c16 = arith.constant 16 : index
    %c128_12 = arith.constant 128 : index
    %29 = vector.load %arg10[%c16, %c128_12] : memref<32x401xbf16, #tpu.memory_space<vmem>>, vector<16x256xbf16>
    tpu.vector_store %arg10[%c16, %c128_12], %28 {strides = array<i32>} : memref<32x401xbf16, #tpu.memory_space<vmem>>, vector<16x256xbf16>,
    %c0_13 = arith.constant 0 : index
    %c111_14 = arith.constant 111 : index
    %30 = vector.load %arg10[%c0_13, %c111_14] : memref<32x401xbf16, #tpu.memory_space<vmem>>, vector<16x256xbf16>
    %cst_15 = arith.constant 0.000000e+00 : bf16
    %31 = vector.broadcast %cst_15 : bf16 to vector<16x256xbf16>
    %32 = arith.select %4, %30, %31 : vector<16x256xi1>, vector<16x256xbf16>
    %c0_16 = arith.constant 0 : index
    %c0_17 = arith.constant 0 : index
    %33 = vector.load %arg11[%c0_16, %c0_17] : memref<144x512xbf16, #tpu.memory_space<vmem>>, vector<16x256xbf16>
    tpu.vector_store %arg11[%c0_16, %c0_17], %32 {strides = array<i32>} : memref<144x512xbf16, #tpu.memory_space<vmem>>, vector<16x256xbf16>,
    %c16_18 = arith.constant 16 : index
    %c111_19 = arith.constant 111 : index
    %34 = vector.load %arg10[%c16_18, %c111_19] : memref<32x401xbf16, #tpu.memory_space<vmem>>, vector<16x256xbf16>
    %cst_20 = arith.constant 0.000000e+00 : bf16
    %35 = vector.broadcast %cst_20 : bf16 to vector<16x256xbf16>
    %36 = arith.select %4, %34, %35 : vector<16x256xi1>, vector<16x256xbf16>
    %c0_21 = arith.constant 0 : index
    %c256 = arith.constant 256 : index
    %37 = vector.load %arg11[%c0_21, %c256] : memref<144x512xbf16, #tpu.memory_space<vmem>>, vector<16x256xbf16>
    tpu.vector_store %arg11[%c0_21, %c256], %36 {strides = array<i32>} : memref<144x512xbf16, #tpu.memory_space<vmem>>, vector<16x256xbf16>,
    %c0_22 = arith.constant 0 : index
    %c112 = arith.constant 112 : index
    %38 = vector.load %arg10[%c0_22, %c112] : memref<32x401xbf16, #tpu.memory_space<vmem>>, vector<16x256xbf16>
    %c16_23 = arith.constant 16 : index
    %c0_24 = arith.constant 0 : index
    %39 = vector.load %arg11[%c16_23, %c0_24] : memref<144x512xbf16, #tpu.memory_space<vmem>>, vector<16x256xbf16>
    tpu.vector_store %arg11[%c16_23, %c0_24], %38 {strides = array<i32>} : memref<144x512xbf16, #tpu.memory_space<vmem>>, vector<16x256xbf16>,
    %c16_25 = arith.constant 16 : index
    %c112_26 = arith.constant 112 : index
    %40 = vector.load %arg10[%c16_25, %c112_26] : memref<32x401xbf16, #tpu.memory_space<vmem>>, vector<16x256xbf16>
    %c16_27 = arith.constant 16 : index
    %c256_28 = arith.constant 256 : index
    %41 = vector.load %arg11[%c16_27, %c256_28] : memref<144x512xbf16, #tpu.memory_space<vmem>>, vector<16x256xbf16>
    tpu.vector_store %arg11[%c16_27, %c256_28], %40 {strides = array<i32>} : memref<144x512xbf16, #tpu.memory_space<vmem>>, vector<16x256xbf16>,
    %c0_29 = arith.constant 0 : index
    %c113 = arith.constant 113 : index
    %42 = vector.load %arg10[%c0_29, %c113] : memref<32x401xbf16, #tpu.memory_space<vmem>>, vector<16x256xbf16>
    %cst_30 = arith.constant 0.000000e+00 : bf16
    %43 = vector.broadcast %cst_30 : bf16 to vector<16x256xbf16>
    %44 = arith.select %8, %42, %43 : vector<16x256xi1>, vector<16x256xbf16>
    %c32 = arith.constant 32 : index
    %c0_31 = arith.constant 0 : index
    %45 = vector.load %arg11[%c32, %c0_31] : memref<144x512xbf16, #tpu.memory_space<vmem>>, vector<16x256xbf16>
    tpu.vector_store %arg11[%c32, %c0_31], %44 {strides = array<i32>} : memref<144x512xbf16, #tpu.memory_space<vmem>>, vector<16x256xbf16>,
    %c16_32 = arith.constant 16 : index
    %c113_33 = arith.constant 113 : index
    %46 = vector.load %arg10[%c16_32, %c113_33] : memref<32x401xbf16, #tpu.memory_space<vmem>>, vector<16x256xbf16>
    %cst_34 = arith.constant 0.000000e+00 : bf16
    %47 = vector.broadcast %cst_34 : bf16 to vector<16x256xbf16>
    %48 = arith.select %8, %46, %47 : vector<16x256xi1>, vector<16x256xbf16>
    %c32_35 = arith.constant 32 : index
    %c256_36 = arith.constant 256 : index
    %49 = vector.load %arg11[%c32_35, %c256_36] : memref<144x512xbf16, #tpu.memory_space<vmem>>, vector<16x256xbf16>
    tpu.vector_store %arg11[%c32_35, %c256_36], %48 {strides = array<i32>} : memref<144x512xbf16, #tpu.memory_space<vmem>>, vector<16x256xbf16>,
    %c0_37 = arith.constant 0 : index
    %c127 = arith.constant 127 : index
    %50 = vector.load %arg10[%c0_37, %c127] : memref<32x401xbf16, #tpu.memory_space<vmem>>, vector<16x256xbf16>
    %cst_38 = arith.constant 0.000000e+00 : bf16
    %51 = vector.broadcast %cst_38 : bf16 to vector<16x256xbf16>
    %52 = arith.select %4, %50, %51 : vector<16x256xi1>, vector<16x256xbf16>
    %c48 = arith.constant 48 : index
    %c0_39 = arith.constant 0 : index
    %53 = vector.load %arg11[%c48, %c0_39] : memref<144x512xbf16, #tpu.memory_space<vmem>>, vector<16x256xbf16>
    tpu.vector_store %arg11[%c48, %c0_39], %52 {strides = array<i32>} : memref<144x512xbf16, #tpu.memory_space<vmem>>, vector<16x256xbf16>,
    %c16_40 = arith.constant 16 : index
    %c127_41 = arith.constant 127 : index
    %54 = vector.load %arg10[%c16_40, %c127_41] : memref<32x401xbf16, #tpu.memory_space<vmem>>, vector<16x256xbf16>
    %cst_42 = arith.constant 0.000000e+00 : bf16
    %55 = vector.broadcast %cst_42 : bf16 to vector<16x256xbf16>
    %56 = arith.select %4, %54, %55 : vector<16x256xi1>, vector<16x256xbf16>
    %c48_43 = arith.constant 48 : index
    %c256_44 = arith.constant 256 : index
    %57 = vector.load %arg11[%c48_43, %c256_44] : memref<144x512xbf16, #tpu.memory_space<vmem>>, vector<16x256xbf16>
    tpu.vector_store %arg11[%c48_43, %c256_44], %56 {strides = array<i32>} : memref<144x512xbf16, #tpu.memory_space<vmem>>, vector<16x256xbf16>,
    %c0_45 = arith.constant 0 : index
    %c128_46 = arith.constant 128 : index
    %58 = vector.load %arg10[%c0_45, %c128_46] : memref<32x401xbf16, #tpu.memory_space<vmem>>, vector<16x256xbf16>
    %c64 = arith.constant 64 : index
    %c0_47 = arith.constant 0 : index
    %59 = vector.load %arg11[%c64, %c0_47] : memref<144x512xbf16, #tpu.memory_space<vmem>>, vector<16x256xbf16>
    tpu.vector_store %arg11[%c64, %c0_47], %58 {strides = array<i32>} : memref<144x512xbf16, #tpu.memory_space<vmem>>, vector<16x256xbf16>,
    %c16_48 = arith.constant 16 : index
    %c128_49 = arith.constant 128 : index
    %60 = vector.load %arg10[%c16_48, %c128_49] : memref<32x401xbf16, #tpu.memory_space<vmem>>, vector<16x256xbf16>
    %c64_50 = arith.constant 64 : index
    %c256_51 = arith.constant 256 : index
    %61 = vector.load %arg11[%c64_50, %c256_51] : memref<144x512xbf16, #tpu.memory_space<vmem>>, vector<16x256xbf16>
    tpu.vector_store %arg11[%c64_50, %c256_51], %60 {strides = array<i32>} : memref<144x512xbf16, #tpu.memory_space<vmem>>, vector<16x256xbf16>,
    %c0_52 = arith.constant 0 : index
    %c129 = arith.constant 129 : index
    %62 = vector.load %arg10[%c0_52, %c129] : memref<32x401xbf16, #tpu.memory_space<vmem>>, vector<16x256xbf16>
    %cst_53 = arith.constant 0.000000e+00 : bf16
    %63 = vector.broadcast %cst_53 : bf16 to vector<16x256xbf16>
    %64 = arith.select %8, %62, %63 : vector<16x256xi1>, vector<16x256xbf16>
    %c80 = arith.constant 80 : index
    %c0_54 = arith.constant 0 : index
    %65 = vector.load %arg11[%c80, %c0_54] : memref<144x512xbf16, #tpu.memory_space<vmem>>, vector<16x256xbf16>
    tpu.vector_store %arg11[%c80, %c0_54], %64 {strides = array<i32>} : memref<144x512xbf16, #tpu.memory_space<vmem>>, vector<16x256xbf16>,
    %c16_55 = arith.constant 16 : index
    %c129_56 = arith.constant 129 : index
    %66 = vector.load %arg10[%c16_55, %c129_56] : memref<32x401xbf16, #tpu.memory_space<vmem>>, vector<16x256xbf16>
    %cst_57 = arith.constant 0.000000e+00 : bf16
    %67 = vector.broadcast %cst_57 : bf16 to vector<16x256xbf16>
    %68 = arith.select %8, %66, %67 : vector<16x256xi1>, vector<16x256xbf16>
    %c80_58 = arith.constant 80 : index
    %c256_59 = arith.constant 256 : index
    %69 = vector.load %arg11[%c80_58, %c256_59] : memref<144x512xbf16, #tpu.memory_space<vmem>>, vector<16x256xbf16>
    tpu.vector_store %arg11[%c80_58, %c256_59], %68 {strides = array<i32>} : memref<144x512xbf16, #tpu.memory_space<vmem>>, vector<16x256xbf16>,
    %c0_60 = arith.constant 0 : index
    %c143 = arith.constant 143 : index
    %70 = vector.load %arg10[%c0_60, %c143] : memref<32x401xbf16, #tpu.memory_space<vmem>>, vector<16x256xbf16>
    %cst_61 = arith.constant 0.000000e+00 : bf16
    %71 = vector.broadcast %cst_61 : bf16 to vector<16x256xbf16>
    %72 = arith.select %4, %70, %71 : vector<16x256xi1>, vector<16x256xbf16>
    %c96 = arith.constant 96 : index
    %c0_62 = arith.constant 0 : index
    %73 = vector.load %arg11[%c96, %c0_62] : memref<144x512xbf16, #tpu.memory_space<vmem>>, vector<16x256xbf16>
    tpu.vector_store %arg11[%c96, %c0_62], %72 {strides = array<i32>} : memref<144x512xbf16, #tpu.memory_space<vmem>>, vector<16x256xbf16>,
    %c16_63 = arith.constant 16 : index
    %c143_64 = arith.constant 143 : index
    %74 = vector.load %arg10[%c16_63, %c143_64] : memref<32x401xbf16, #tpu.memory_space<vmem>>, vector<16x256xbf16>
    %cst_65 = arith.constant 0.000000e+00 : bf16
    %75 = vector.broadcast %cst_65 : bf16 to vector<16x256xbf16>
    %76 = arith.select %4, %74, %75 : vector<16x256xi1>, vector<16x256xbf16>
    %c96_66 = arith.constant 96 : index
    %c256_67 = arith.constant 256 : index
    %77 = vector.load %arg11[%c96_66, %c256_67] : memref<144x512xbf16, #tpu.memory_space<vmem>>, vector<16x256xbf16>
    tpu.vector_store %arg11[%c96_66, %c256_67], %76 {strides = array<i32>} : memref<144x512xbf16, #tpu.memory_space<vmem>>, vector<16x256xbf16>,
    %c0_68 = arith.constant 0 : index
    %c144 = arith.constant 144 : index
    %78 = vector.load %arg10[%c0_68, %c144] : memref<32x401xbf16, #tpu.memory_space<vmem>>, vector<16x256xbf16>
    %c112_69 = arith.constant 112 : index
    %c0_70 = arith.constant 0 : index
    %79 = vector.load %arg11[%c112_69, %c0_70] : memref<144x512xbf16, #tpu.memory_space<vmem>>, vector<16x256xbf16>
    tpu.vector_store %arg11[%c112_69, %c0_70], %78 {strides = array<i32>} : memref<144x512xbf16, #tpu.memory_space<vmem>>, vector<16x256xbf16>,
    %c16_71 = arith.constant 16 : index
    %c144_72 = arith.constant 144 : index
    %80 = vector.load %arg10[%c16_71, %c144_72] : memref<32x401xbf16, #tpu.memory_space<vmem>>, vector<16x256xbf16>
    %c112_73 = arith.constant 112 : index
    %c256_74 = arith.constant 256 : index
    %81 = vector.load %arg11[%c112_73, %c256_74] : memref<144x512xbf16, #tpu.memory_space<vmem>>, vector<16x256xbf16>
    tpu.vector_store %arg11[%c112_73, %c256_74], %80 {strides = array<i32>} : memref<144x512xbf16, #tpu.memory_space<vmem>>, vector<16x256xbf16>,
    %c0_75 = arith.constant 0 : index
    %c145 = arith.constant 145 : index
    %82 = vector.load %arg10[%c0_75, %c145] : memref<32x401xbf16, #tpu.memory_space<vmem>>, vector<16x256xbf16>
    %cst_76 = arith.constant 0.000000e+00 : bf16
    %83 = vector.broadcast %cst_76 : bf16 to vector<16x256xbf16>
    %84 = arith.select %8, %82, %83 : vector<16x256xi1>, vector<16x256xbf16>
    %c128_77 = arith.constant 128 : index
    %c0_78 = arith.constant 0 : index
    %85 = vector.load %arg11[%c128_77, %c0_78] : memref<144x512xbf16, #tpu.memory_space<vmem>>, vector<16x256xbf16>
    tpu.vector_store %arg11[%c128_77, %c0_78], %84 {strides = array<i32>} : memref<144x512xbf16, #tpu.memory_space<vmem>>, vector<16x256xbf16>,
    %c16_79 = arith.constant 16 : index
    %c145_80 = arith.constant 145 : index
    %86 = vector.load %arg10[%c16_79, %c145_80] : memref<32x401xbf16, #tpu.memory_space<vmem>>, vector<16x256xbf16>
    %cst_81 = arith.constant 0.000000e+00 : bf16
    %87 = vector.broadcast %cst_81 : bf16 to vector<16x256xbf16>
    %88 = arith.select %8, %86, %87 : vector<16x256xi1>, vector<16x256xbf16>
    %c128_82 = arith.constant 128 : index
    %c256_83 = arith.constant 256 : index
    %89 = vector.load %arg11[%c128_82, %c256_83] : memref<144x512xbf16, #tpu.memory_space<vmem>>, vector<16x256xbf16>
    tpu.vector_store %arg11[%c128_82, %c256_83], %88 {strides = array<i32>} : memref<144x512xbf16, #tpu.memory_space<vmem>>, vector<16x256xbf16>,
    %c0_84 = arith.constant 0 : index
    %c0_85 = arith.constant 0 : index
    %90 = vector.load %arg5[%c0_84, %c0_85] : memref<16x144xbf16, #tpu.memory_space<vmem>>, vector<16x144xbf16>
    %c0_86 = arith.constant 0 : index
    %c0_87 = arith.constant 0 : index
    %91 = vector.load %arg11[%c0_86, %c0_87] : memref<144x512xbf16, #tpu.memory_space<vmem>>, vector<144x512xbf16>
    %cst_88 = arith.constant dense<0.000000e+00> : vector<16x512xf32>
    %92 = tpu.matmul %90, %91, %cst_88 {dimension_numbers = #tpu.dot_dimension_numbers<[1], [0], [0], [1], [0, 0, 1, 1], [], []>} : vector<16x144xbf16>, vector<144x512xbf16>, vector<16x512xf32> -> vector<16x512xf32>
    %c0_89 = arith.constant 0 : index
    %c0_90 = arith.constant 0 : index
    %93 = vector.load %arg6[%c0_89, %c0_90] : memref<16x1xf32, #tpu.memory_space<vmem>>, vector<16x1xf32>
    %94 = vector.broadcast %93 : vector<16x1xf32> to vector<16x512xf32>
    %95 = arith.mulf %92, %94 : vector<16x512xf32>
    %c0_91 = arith.constant 0 : index
    %c0_92 = arith.constant 0 : index
    %96 = vector.load %arg7[%c0_91, %c0_92] : memref<16x1xf32, #tpu.memory_space<vmem>>, vector<16x1xf32>
    %97 = vector.broadcast %96 : vector<16x1xf32> to vector<16x512xf32>
    %98 = arith.addf %95, %97 : vector<16x512xf32>
    %cst_93 = arith.constant 0.000000e+00 : f32
    %99 = vector.broadcast %cst_93 : f32 to vector<16x512xf32>
    %100 = arith.maximumf %98, %99 : vector<16x512xf32>
    %101 = arith.truncf %100 : vector<16x512xf32> to vector<16x512xbf16>
    %102 = vector.extract_strided_slice %101 {offsets = [0, 0], sizes = [16, 256], strides = [1, 1]} : vector<16x512xbf16> to vector<16x256xbf16>
    %c0_94 = arith.constant 0 : index
    %c128_95 = arith.constant 128 : index
    %103 = vector.load %arg10[%c0_94, %c128_95] : memref<32x401xbf16, #tpu.memory_space<vmem>>, vector<16x256xbf16>
    tpu.vector_store %arg10[%c0_94, %c128_95], %102 {strides = array<i32>} : memref<32x401xbf16, #tpu.memory_space<vmem>>, vector<16x256xbf16>,
    %104 = vector.extract_strided_slice %101 {offsets = [0, 256], sizes = [16, 256], strides = [1, 1]} : vector<16x512xbf16> to vector<16x256xbf16>
    %c16_96 = arith.constant 16 : index
    %c128_97 = arith.constant 128 : index
    %105 = vector.load %arg10[%c16_96, %c128_97] : memref<32x401xbf16, #tpu.memory_space<vmem>>, vector<16x256xbf16>
    tpu.vector_store %arg10[%c16_96, %c128_97], %104 {strides = array<i32>} : memref<32x401xbf16, #tpu.memory_space<vmem>>, vector<16x256xbf16>,
    %c0_98 = arith.constant 0 : index
    %c111_99 = arith.constant 111 : index
    %106 = vector.load %arg10[%c0_98, %c111_99] : memref<32x401xbf16, #tpu.memory_space<vmem>>, vector<16x256xbf16>
    %cst_100 = arith.constant 0.000000e+00 : bf16
    %107 = vector.broadcast %cst_100 : bf16 to vector<16x256xbf16>
    %108 = arith.select %4, %106, %107 : vector<16x256xi1>, vector<16x256xbf16>
    %c0_101 = arith.constant 0 : index
    %c0_102 = arith.constant 0 : index
    %109 = vector.load %arg11[%c0_101, %c0_102] : memref<144x512xbf16, #tpu.memory_space<vmem>>, vector<16x256xbf16>
    tpu.vector_store %arg11[%c0_101, %c0_102], %108 {strides = array<i32>} : memref<144x512xbf16, #tpu.memory_space<vmem>>, vector<16x256xbf16>,
    %c16_103 = arith.constant 16 : index
    %c111_104 = arith.constant 111 : index
    %110 = vector.load %arg10[%c16_103, %c111_104] : memref<32x401xbf16, #tpu.memory_space<vmem>>, vector<16x256xbf16>
    %cst_105 = arith.constant 0.000000e+00 : bf16
    %111 = vector.broadcast %cst_105 : bf16 to vector<16x256xbf16>
    %112 = arith.select %4, %110, %111 : vector<16x256xi1>, vector<16x256xbf16>
    %c0_106 = arith.constant 0 : index
    %c256_107 = arith.constant 256 : index
    %113 = vector.load %arg11[%c0_106, %c256_107] : memref<144x512xbf16, #tpu.memory_space<vmem>>, vector<16x256xbf16>
    tpu.vector_store %arg11[%c0_106, %c256_107], %112 {strides = array<i32>} : memref<144x512xbf16, #tpu.memory_space<vmem>>, vector<16x256xbf16>,
    %c0_108 = arith.constant 0 : index
    %c112_109 = arith.constant 112 : index
    %114 = vector.load %arg10[%c0_108, %c112_109] : memref<32x401xbf16, #tpu.memory_space<vmem>>, vector<16x256xbf16>
    %c16_110 = arith.constant 16 : index
    %c0_111 = arith.constant 0 : index
    %115 = vector.load %arg11[%c16_110, %c0_111] : memref<144x512xbf16, #tpu.memory_space<vmem>>, vector<16x256xbf16>
    tpu.vector_store %arg11[%c16_110, %c0_111], %114 {strides = array<i32>} : memref<144x512xbf16, #tpu.memory_space<vmem>>, vector<16x256xbf16>,
    %c16_112 = arith.constant 16 : index
    %c112_113 = arith.constant 112 : index
    %116 = vector.load %arg10[%c16_112, %c112_113] : memref<32x401xbf16, #tpu.memory_space<vmem>>, vector<16x256xbf16>
    %c16_114 = arith.constant 16 : index
    %c256_115 = arith.constant 256 : index
    %117 = vector.load %arg11[%c16_114, %c256_115] : memref<144x512xbf16, #tpu.memory_space<vmem>>, vector<16x256xbf16>
    tpu.vector_store %arg11[%c16_114, %c256_115], %116 {strides = array<i32>} : memref<144x512xbf16, #tpu.memory_space<vmem>>, vector<16x256xbf16>,
    %c0_116 = arith.constant 0 : index
    %c113_117 = arith.constant 113 : index
    %118 = vector.load %arg10[%c0_116, %c113_117] : memref<32x401xbf16, #tpu.memory_space<vmem>>, vector<16x256xbf16>
    %cst_118 = arith.constant 0.000000e+00 : bf16
    %119 = vector.broadcast %cst_118 : bf16 to vector<16x256xbf16>
    %120 = arith.select %8, %118, %119 : vector<16x256xi1>, vector<16x256xbf16>
    %c32_119 = arith.constant 32 : index
    %c0_120 = arith.constant 0 : index
    %121 = vector.load %arg11[%c32_119, %c0_120] : memref<144x512xbf16, #tpu.memory_space<vmem>>, vector<16x256xbf16>
    tpu.vector_store %arg11[%c32_119, %c0_120], %120 {strides = array<i32>} : memref<144x512xbf16, #tpu.memory_space<vmem>>, vector<16x256xbf16>,
    %c16_121 = arith.constant 16 : index
    %c113_122 = arith.constant 113 : index
    %122 = vector.load %arg10[%c16_121, %c113_122] : memref<32x401xbf16, #tpu.memory_space<vmem>>, vector<16x256xbf16>
    %cst_123 = arith.constant 0.000000e+00 : bf16
    %123 = vector.broadcast %cst_123 : bf16 to vector<16x256xbf16>
    %124 = arith.select %8, %122, %123 : vector<16x256xi1>, vector<16x256xbf16>
    %c32_124 = arith.constant 32 : index
    %c256_125 = arith.constant 256 : index
    %125 = vector.load %arg11[%c32_124, %c256_125] : memref<144x512xbf16, #tpu.memory_space<vmem>>, vector<16x256xbf16>
    tpu.vector_store %arg11[%c32_124, %c256_125], %124 {strides = array<i32>} : memref<144x512xbf16, #tpu.memory_space<vmem>>, vector<16x256xbf16>,
    %c0_126 = arith.constant 0 : index
    %c127_127 = arith.constant 127 : index
    %126 = vector.load %arg10[%c0_126, %c127_127] : memref<32x401xbf16, #tpu.memory_space<vmem>>, vector<16x256xbf16>
    %cst_128 = arith.constant 0.000000e+00 : bf16
    %127 = vector.broadcast %cst_128 : bf16 to vector<16x256xbf16>
    %128 = arith.select %4, %126, %127 : vector<16x256xi1>, vector<16x256xbf16>
    %c48_129 = arith.constant 48 : index
    %c0_130 = arith.constant 0 : index
    %129 = vector.load %arg11[%c48_129, %c0_130] : memref<144x512xbf16, #tpu.memory_space<vmem>>, vector<16x256xbf16>
    tpu.vector_store %arg11[%c48_129, %c0_130], %128 {strides = array<i32>} : memref<144x512xbf16, #tpu.memory_space<vmem>>, vector<16x256xbf16>,
    %c16_131 = arith.constant 16 : index
    %c127_132 = arith.constant 127 : index
    %130 = vector.load %arg10[%c16_131, %c127_132] : memref<32x401xbf16, #tpu.memory_space<vmem>>, vector<16x256xbf16>
    %cst_133 = arith.constant 0.000000e+00 : bf16
    %131 = vector.broadcast %cst_133 : bf16 to vector<16x256xbf16>
    %132 = arith.select %4, %130, %131 : vector<16x256xi1>, vector<16x256xbf16>
    %c48_134 = arith.constant 48 : index
    %c256_135 = arith.constant 256 : index
    %133 = vector.load %arg11[%c48_134, %c256_135] : memref<144x512xbf16, #tpu.memory_space<vmem>>, vector<16x256xbf16>
    tpu.vector_store %arg11[%c48_134, %c256_135], %132 {strides = array<i32>} : memref<144x512xbf16, #tpu.memory_space<vmem>>, vector<16x256xbf16>,
    %c0_136 = arith.constant 0 : index
    %c128_137 = arith.constant 128 : index
    %134 = vector.load %arg10[%c0_136, %c128_137] : memref<32x401xbf16, #tpu.memory_space<vmem>>, vector<16x256xbf16>
    %c64_138 = arith.constant 64 : index
    %c0_139 = arith.constant 0 : index
    %135 = vector.load %arg11[%c64_138, %c0_139] : memref<144x512xbf16, #tpu.memory_space<vmem>>, vector<16x256xbf16>
    tpu.vector_store %arg11[%c64_138, %c0_139], %134 {strides = array<i32>} : memref<144x512xbf16, #tpu.memory_space<vmem>>, vector<16x256xbf16>,
    %c16_140 = arith.constant 16 : index
    %c128_141 = arith.constant 128 : index
    %136 = vector.load %arg10[%c16_140, %c128_141] : memref<32x401xbf16, #tpu.memory_space<vmem>>, vector<16x256xbf16>
    %c64_142 = arith.constant 64 : index
    %c256_143 = arith.constant 256 : index
    %137 = vector.load %arg11[%c64_142, %c256_143] : memref<144x512xbf16, #tpu.memory_space<vmem>>, vector<16x256xbf16>
    tpu.vector_store %arg11[%c64_142, %c256_143], %136 {strides = array<i32>} : memref<144x512xbf16, #tpu.memory_space<vmem>>, vector<16x256xbf16>,
    %c0_144 = arith.constant 0 : index
    %c129_145 = arith.constant 129 : index
    %138 = vector.load %arg10[%c0_144, %c129_145] : memref<32x401xbf16, #tpu.memory_space<vmem>>, vector<16x256xbf16>
    %cst_146 = arith.constant 0.000000e+00 : bf16
    %139 = vector.broadcast %cst_146 : bf16 to vector<16x256xbf16>
    %140 = arith.select %8, %138, %139 : vector<16x256xi1>, vector<16x256xbf16>
    %c80_147 = arith.constant 80 : index
    %c0_148 = arith.constant 0 : index
    %141 = vector.load %arg11[%c80_147, %c0_148] : memref<144x512xbf16, #tpu.memory_space<vmem>>, vector<16x256xbf16>
    tpu.vector_store %arg11[%c80_147, %c0_148], %140 {strides = array<i32>} : memref<144x512xbf16, #tpu.memory_space<vmem>>, vector<16x256xbf16>,
    %c16_149 = arith.constant 16 : index
    %c129_150 = arith.constant 129 : index
    %142 = vector.load %arg10[%c16_149, %c129_150] : memref<32x401xbf16, #tpu.memory_space<vmem>>, vector<16x256xbf16>
    %cst_151 = arith.constant 0.000000e+00 : bf16
    %143 = vector.broadcast %cst_151 : bf16 to vector<16x256xbf16>
    %144 = arith.select %8, %142, %143 : vector<16x256xi1>, vector<16x256xbf16>
    %c80_152 = arith.constant 80 : index
    %c256_153 = arith.constant 256 : index
    %145 = vector.load %arg11[%c80_152, %c256_153] : memref<144x512xbf16, #tpu.memory_space<vmem>>, vector<16x256xbf16>
    tpu.vector_store %arg11[%c80_152, %c256_153], %144 {strides = array<i32>} : memref<144x512xbf16, #tpu.memory_space<vmem>>, vector<16x256xbf16>,
    %c0_154 = arith.constant 0 : index
    %c143_155 = arith.constant 143 : index
    %146 = vector.load %arg10[%c0_154, %c143_155] : memref<32x401xbf16, #tpu.memory_space<vmem>>, vector<16x256xbf16>
    %cst_156 = arith.constant 0.000000e+00 : bf16
    %147 = vector.broadcast %cst_156 : bf16 to vector<16x256xbf16>
    %148 = arith.select %4, %146, %147 : vector<16x256xi1>, vector<16x256xbf16>
    %c96_157 = arith.constant 96 : index
    %c0_158 = arith.constant 0 : index
    %149 = vector.load %arg11[%c96_157, %c0_158] : memref<144x512xbf16, #tpu.memory_space<vmem>>, vector<16x256xbf16>
    tpu.vector_store %arg11[%c96_157, %c0_158], %148 {strides = array<i32>} : memref<144x512xbf16, #tpu.memory_space<vmem>>, vector<16x256xbf16>,
    %c16_159 = arith.constant 16 : index
    %c143_160 = arith.constant 143 : index
    %150 = vector.load %arg10[%c16_159, %c143_160] : memref<32x401xbf16, #tpu.memory_space<vmem>>, vector<16x256xbf16>
    %cst_161 = arith.constant 0.000000e+00 : bf16
    %151 = vector.broadcast %cst_161 : bf16 to vector<16x256xbf16>
    %152 = arith.select %4, %150, %151 : vector<16x256xi1>, vector<16x256xbf16>
    %c96_162 = arith.constant 96 : index
    %c256_163 = arith.constant 256 : index
    %153 = vector.load %arg11[%c96_162, %c256_163] : memref<144x512xbf16, #tpu.memory_space<vmem>>, vector<16x256xbf16>
    tpu.vector_store %arg11[%c96_162, %c256_163], %152 {strides = array<i32>} : memref<144x512xbf16, #tpu.memory_space<vmem>>, vector<16x256xbf16>,
    %c0_164 = arith.constant 0 : index
    %c144_165 = arith.constant 144 : index
    %154 = vector.load %arg10[%c0_164, %c144_165] : memref<32x401xbf16, #tpu.memory_space<vmem>>, vector<16x256xbf16>
    %c112_166 = arith.constant 112 : index
    %c0_167 = arith.constant 0 : index
    %155 = vector.load %arg11[%c112_166, %c0_167] : memref<144x512xbf16, #tpu.memory_space<vmem>>, vector<16x256xbf16>
    tpu.vector_store %arg11[%c112_166, %c0_167], %154 {strides = array<i32>} : memref<144x512xbf16, #tpu.memory_space<vmem>>, vector<16x256xbf16>,
    %c16_168 = arith.constant 16 : index
    %c144_169 = arith.constant 144 : index
    %156 = vector.load %arg10[%c16_168, %c144_169] : memref<32x401xbf16, #tpu.memory_space<vmem>>, vector<16x256xbf16>
    %c112_170 = arith.constant 112 : index
    %c256_171 = arith.constant 256 : index
    %157 = vector.load %arg11[%c112_170, %c256_171] : memref<144x512xbf16, #tpu.memory_space<vmem>>, vector<16x256xbf16>
    tpu.vector_store %arg11[%c112_170, %c256_171], %156 {strides = array<i32>} : memref<144x512xbf16, #tpu.memory_space<vmem>>, vector<16x256xbf16>,
    %c0_172 = arith.constant 0 : index
    %c145_173 = arith.constant 145 : index
    %158 = vector.load %arg10[%c0_172, %c145_173] : memref<32x401xbf16, #tpu.memory_space<vmem>>, vector<16x256xbf16>
    %cst_174 = arith.constant 0.000000e+00 : bf16
    %159 = vector.broadcast %cst_174 : bf16 to vector<16x256xbf16>
    %160 = arith.select %8, %158, %159 : vector<16x256xi1>, vector<16x256xbf16>
    %c128_175 = arith.constant 128 : index
    %c0_176 = arith.constant 0 : index
    %161 = vector.load %arg11[%c128_175, %c0_176] : memref<144x512xbf16, #tpu.memory_space<vmem>>, vector<16x256xbf16>
    tpu.vector_store %arg11[%c128_175, %c0_176], %160 {strides = array<i32>} : memref<144x512xbf16, #tpu.memory_space<vmem>>, vector<16x256xbf16>,
    %c16_177 = arith.constant 16 : index
    %c145_178 = arith.constant 145 : index
    %162 = vector.load %arg10[%c16_177, %c145_178] : memref<32x401xbf16, #tpu.memory_space<vmem>>, vector<16x256xbf16>
    %cst_179 = arith.constant 0.000000e+00 : bf16
    %163 = vector.broadcast %cst_179 : bf16 to vector<16x256xbf16>
    %164 = arith.select %8, %162, %163 : vector<16x256xi1>, vector<16x256xbf16>
    %c128_180 = arith.constant 128 : index
    %c256_181 = arith.constant 256 : index
    %165 = vector.load %arg11[%c128_180, %c256_181] : memref<144x512xbf16, #tpu.memory_space<vmem>>, vector<16x256xbf16>
    tpu.vector_store %arg11[%c128_180, %c256_181], %164 {strides = array<i32>} : memref<144x512xbf16, #tpu.memory_space<vmem>>, vector<16x256xbf16>,
    %c0_182 = arith.constant 0 : index
    %c0_183 = arith.constant 0 : index
    %166 = vector.load %arg8[%c0_182, %c0_183] : memref<16x144xbf16, #tpu.memory_space<vmem>>, vector<16x144xbf16>
    %c0_184 = arith.constant 0 : index
    %c0_185 = arith.constant 0 : index
    %167 = vector.load %arg11[%c0_184, %c0_185] : memref<144x512xbf16, #tpu.memory_space<vmem>>, vector<144x512xbf16>
    %cst_186 = arith.constant dense<0.000000e+00> : vector<16x512xf32>
    %168 = tpu.matmul %166, %167, %cst_186 {dimension_numbers = #tpu.dot_dimension_numbers<[1], [0], [0], [1], [0, 0, 1, 1], [], []>} : vector<16x144xbf16>, vector<144x512xbf16>, vector<16x512xf32> -> vector<16x512xf32>
    %169 = vector.extract_strided_slice %168 {offsets = [0, 0], sizes = [16, 256], strides = [1, 1]} : vector<16x512xf32> to vector<16x256xf32>
    %c0_187 = arith.constant 0 : index
    %c0_188 = arith.constant 0 : index
    %c0_189 = arith.constant 0 : index
    %170 = vector.load %arg1[%c0_187, %c0_188, %c0_189] : memref<2x16x256xf32, #tpu.memory_space<vmem>>, vector<1x16x256xf32>
    %171 = vector.shape_cast %170 : vector<1x16x256xf32> to vector<16x256xf32>
    %172 = arith.addf %169, %171 : vector<16x256xf32>
    %c0_190 = arith.constant 0 : index
    %c0_191 = arith.constant 0 : index
    %c0_192 = arith.constant 0 : index
    %173 = vector.load %arg9[%c0_190, %c0_191, %c0_192] : memref<2x16x256xf32, #tpu.memory_space<vmem>>, vector<1x16x256xf32>
    %174 = vector.shape_cast %173 : vector<1x16x256xf32> to vector<16x256xf32>
    %175 = vector.shape_cast %172 : vector<16x256xf32> to vector<1x16x256xf32>
    tpu.vector_store %arg9[%c0_190, %c0_191, %c0_192], %175 {strides = array<i32>} : memref<2x16x256xf32, #tpu.memory_space<vmem>>, vector<1x16x256xf32>,
    %176 = vector.extract_strided_slice %168 {offsets = [0, 256], sizes = [16, 256], strides = [1, 1]} : vector<16x512xf32> to vector<16x256xf32>
    %c1 = arith.constant 1 : index
    %c0_193 = arith.constant 0 : index
    %c0_194 = arith.constant 0 : index
    %177 = vector.load %arg1[%c1, %c0_193, %c0_194] : memref<2x16x256xf32, #tpu.memory_space<vmem>>, vector<1x16x256xf32>
    %178 = vector.shape_cast %177 : vector<1x16x256xf32> to vector<16x256xf32>
    %179 = arith.addf %176, %178 : vector<16x256xf32>
    %c1_195 = arith.constant 1 : index
    %c0_196 = arith.constant 0 : index
    %c0_197 = arith.constant 0 : index
    %180 = vector.load %arg9[%c1_195, %c0_196, %c0_197] : memref<2x16x256xf32, #tpu.memory_space<vmem>>, vector<1x16x256xf32>
    %181 = vector.shape_cast %180 : vector<1x16x256xf32> to vector<16x256xf32>
    %182 = vector.shape_cast %179 : vector<16x256xf32> to vector<1x16x256xf32>
    tpu.vector_store %arg9[%c1_195, %c0_196, %c0_197], %182 {strides = array<i32>} : memref<2x16x256xf32, #tpu.memory_space<vmem>>, vector<1x16x256xf32>,
    return
  }
  func.func @transform_0(%arg0: i32) -> (i32, i32, i32) {
    %c0_i32 = arith.constant 0 : i32
    %c0_i32_0 = arith.constant 0 : i32
    %c0_i32_1 = arith.constant 0 : i32
    return %arg0, %c0_i32, %c0_i32_0 : i32, i32, i32
  }
  func.func @transform_1(%arg0: i32) -> (i32, i32) {
    %c0_i32 = arith.constant 0 : i32
    %c0_i32_0 = arith.constant 0 : i32
    %c0_i32_1 = arith.constant 0 : i32
    return %c0_i32, %c0_i32_0 : i32, i32
  }
  func.func @transform_2(%arg0: i32) -> (i32, i32) {
    %c0_i32 = arith.constant 0 : i32
    %c0_i32_0 = arith.constant 0 : i32
    %c0_i32_1 = arith.constant 0 : i32
    return %c0_i32, %c0_i32_0 : i32, i32
  }
  func.func @transform_3(%arg0: i32) -> (i32, i32) {
    %c0_i32 = arith.constant 0 : i32
    %c0_i32_0 = arith.constant 0 : i32
    %c0_i32_1 = arith.constant 0 : i32
    return %c0_i32, %c0_i32_0 : i32, i32
  }
  func.func @transform_4(%arg0: i32) -> (i32, i32) {
    %c0_i32 = arith.constant 0 : i32
    %c0_i32_0 = arith.constant 0 : i32
    %c0_i32_1 = arith.constant 0 : i32
    return %c0_i32, %c0_i32_0 : i32, i32
  }
  func.func @transform_5(%arg0: i32) -> (i32, i32) {
    %c0_i32 = arith.constant 0 : i32
    %c0_i32_0 = arith.constant 0 : i32
    %c0_i32_1 = arith.constant 0 : i32
    return %c0_i32, %c0_i32_0 : i32, i32
  }
  func.func @transform_6(%arg0: i32) -> (i32, i32) {
    %c0_i32 = arith.constant 0 : i32
    %c0_i32_0 = arith.constant 0 : i32
    %c0_i32_1 = arith.constant 0 : i32
    return %c0_i32, %c0_i32_0 : i32, i32
  }
  func.func @transform_7(%arg0: i32) -> (i32, i32) {
    %c0_i32 = arith.constant 0 : i32
    %c0_i32_0 = arith.constant 0 : i32
    %c0_i32_1 = arith.constant 0 : i32
    return %c0_i32, %c0_i32_0 : i32, i32
  }
  func.func @transform_8(%arg0: i32) -> (i32, i32, i32) {
    %c0_i32 = arith.constant 0 : i32
    %c0_i32_0 = arith.constant 0 : i32
    %c0_i32_1 = arith.constant 0 : i32
    return %arg0, %c0_i32, %c0_i32_0 : i32, i32, i32
  }
}

</mosaic_0001>

<bundles_post_ra>
// kernel: basic_block.1
= control target key start
LH: loop header
LB: loop body
LE: loop exit
PB: predicated region body
PF: predicated region fallthrough
CT: control target
= control target key end

     0   :  { %s2851_s27 = smov 0   ;;  %s3724_s0 = inlined_call_operand.vmem [shape: f32[4,16,256], index: 0, kind: input, shape index: {}]   ;;  %s3725_s1 = inlined_call_operand.vmem [shape: s32[1,256], index: 1, kind: input, shape index: {}]   ;;  %s3726_s2 = inlined_call_operand.vmem [shape: f32[16,1], index: 2, kind: input, shape index: {}]   ;;  %s3727_s3 = inlined_call_operand.vmem [shape: f32[16,1], index: 3, kind: input, shape index: {}]   ;;  %s3728_s4 = inlined_call_operand.vmem [shape: bf16[16,144], index: 4, kind: input, shape index: {}]   ;;  %s3729_s5 = inlined_call_operand.vmem [shape: f32[16,1], index: 5, kind: input, shape index: {}]   ;;  %s3730_s6 = inlined_call_operand.vmem [shape: f32[16,1], index: 6, kind: input, shape index: {}]   ;;  %s3731_s7 = inlined_call_operand.vmem [shape: bf16[16,144], index: 7, kind: input, shape index: {}]   ;;  %s3732_s8 = inlined_call_operand.vmem [shape: f32[4,16,256], index: 8, kind: output, shape index: {}]  }
   0x1 LB: > { %s2358_s28 = sadd.s32 4294967295, %s2795_s27   ;;  %p2362_p0 = scmp.ge.s32.totalorder %s2795_s27, 1  ;;  %s2795_s27 = sphi %s2851_s27, %s18_s27  }
   0x2   : > { %p264_p1 = scmp.lt.s32.totalorder %s2795_s27, 3 }
   0x4   : > { %p265_p2 = pnand %p2362_p0, %p264_p1 }
   0x5   : > { %s2798_s17 = smov (!%p265_p2), 15   ;;  %s2799_s18 = smov (!%p265_p2), 1  }
   0x6   : > { %268 = sbr.rel (%p265_p2) target bundleno = 927 (0x39f), region = 52  ;;  %s2800_s19 = smov (!%p265_p2), 17  }
   0x7   : > { %s2801_s20 = smov (!%p265_p2), 127   ;;  %s2802_s21 = smov (!%p265_p2), 113  }
   0x8   : > { %s2803_s22 = smov (!%p265_p2), 111   ;;  %s2804_s23 = smov (!%p265_p2), 112  }
   0x9   : > { %s2363_s24 = sshll.u32 (!%p265_p2), %s2358_s28, 1  ;;  %s2805_s30 = smov (!%p265_p2), 16  }
   0xa   : > { %p301_p3 = scmp.lt.s32.totalorder (!%p265_p2), %s2363_s24, 3 }
   0xb   : > { %v342_v0 = vld [vmem:[%s3727_s3] sm:$0xff]  ;;  %v2797_v2 = vmov 0   ;;  %vm335_vm0 = vcmask 134144   ;;  %v343_v10 = vld [vmem:[%s3727_s3 + $0x8] sm:$0xff]  ;;  %vm330_vm9 = vcmask 1044344   ;;  %vm3734_vm10 = vcmask 121856  }
   0xc   : > { %v340_v1 = vld [vmem:[%s3726_s2] sm:$0xff]  ;;  %2787 = vset.pattern.permute.xlu1 %v2797_v2  ;;  %2786 = vset.pattern.permute.xlu0 %v2797_v2  ;;  %339 = vst.msk [vmem:[#allocation2 + $0x3c] sm:$0xf] %vm335_vm0, %v2797_v2  ;;  %v341_v11 = vld [vmem:[%s3726_s2 + $0x8] sm:$0xff]  ;;  %v2886_v19 = vunpack.c.l.b16 %v2797_v2  ;;  %v2888_v20 = vunpack.c.h.b16 %v2797_v2  ;;  %s3818_s24 = smov (!%p301_p3, %s2363_s24), 3 }
   0xd   : > { %v317_v3 = vld [vmem:[%s3725_s1] sm:$0x3]  ;;  %372 = vperm.xlu1 %2787, %v342_v0   ;;  %354 = vperm.xlu0 %2786, %v340_v1   ;;  %336 = vst.msk [vmem:[#allocation2 + $0xc] sm:$0xf] %vm335_vm0, %v2797_v2  ;;  %s2691_s25 = sshll.u32 %s3818_s24, 5 }
   0xe   : > { %vm318_vm1 = vcmp.ne.s32.totalorder %v317_v3, 0  ;;  %vm324_vm2 = vcmp.ne.s32.totalorder %v317_v3, 15  ;;  %2788 = vset.pattern.permute.xlu2 %v2797_v2  ;;  %337 = vst.msk [vmem:[#allocation2 + $0x1c] sm:$0xf] %vm335_vm0, %v2797_v2  ;;  %s2924_s29 = scalar_lea.vmem %s3724_s0, %s2691_s25  ;;  %s3704_s26 = scalar_lea.vmem %s3732_s8, %s2691_s25 }
   0xf   : > { %v319_v4 = vsel %vm318_vm1, 1, %v2797_v2  ;;  %v325_v5 = vsel %vm324_vm2, 1, %v2797_v2  ;;  %338 = vst.msk [vmem:[#allocation2 + $0x2c] sm:$0xf] %vm335_vm0, %v2797_v2  ;;  %v344_v40 = vld [vmem:[%s2924_s29] sm:$0xff]  ;;  %v345_v41 = vld [vmem:[%s2924_s29 + $0x8] sm:$0xff] }
  0x10   : > { %v320_v6 = vperm.slane %v319_v4, 0  ;;  %v321_v7 = vperm.slane %v319_v4, 1  ;;  %v326_v8 = vperm.slane %v325_v5, 0  ;;  %v327_v9 = vperm.slane %v325_v5, 1  ;;  %331 = vst.msk [vmem:[#allocation2] sm:$0xf] %vm330_vm9, %v2797_v2 }
  0x11   : > { %332 = vst.msk [vmem:[#allocation2 + $0x10] sm:$0xf] %vm330_vm9, %v2797_v2  ;;  %v348_v42 = vld [vmem:[%s2924_s29 + $0x20] sm:$0xff]  ;;  %v349_v43 = vld [vmem:[%s2924_s29 + $0x28] sm:$0xff]  ;;  %v346_v5 = vld [vmem:[%s2924_s29 + $0x10] sm:$0xff] }
  0x12   : > { %vm322_vm3 = vcmp.eq.s32.totalorder %v320_v6, 1  ;;  %vm323_vm4 = vcmp.eq.s32.totalorder %v321_v7, 1  ;;  %vm328_vm6 = vcmp.eq.s32.totalorder %v326_v8, 1  ;;  %vm329_vm7 = vcmp.eq.s32.totalorder %v327_v9, 1  ;;  %333 = vst.msk [vmem:[#allocation2 + $0x20] sm:$0xf] %vm330_vm9, %v2797_v2 }
  0x13   : > { %vm408_vm5 = vmpackc.low %vm323_vm4, %vm322_vm3  ;;  %v922_v14 = vld [vmem:[#allocation2 + $0x3c] sm:$0xf]  ;;  %334 = vst.msk [vmem:[#allocation2 + $0x30] sm:$0xf] %vm330_vm9, %v2797_v2  ;;  %vm3737_vm4 = vcmask 924672   ;;  %v350_v8 = vld [vmem:[%s2924_s29 + $0x30] sm:$0xff] }
  0x14   : > { %v409_v12 = vsel %vm408_vm5, 65537, %v2797_v2  ;;  %vm552_vm8 = vmpackc.low %vm329_vm7, %vm328_vm6  ;;  %v891_v16 = vld [vmem:[#allocation2 + $0xc] sm:$0xf]  ;;  %v347_v7 = vld [vmem:[%s2924_s29 + $0x18] sm:$0xff] }
  0x15   : > { %812 = vrot.lane.b32.xlu2 %v409_v12, %s2798_s17  ;;  %377 = vperm.xlu1 %2787, %v343_v10   ;;  %v553_v13 = vsel %vm552_vm8, 65537, %v2797_v2  ;;  %v893_v15 = vld [vmem:[#allocation2 + $0x1c] sm:$0xf]  ;;  %v809_v27 = vld [vmem:[#allocation2 + $0xc] sm:$0xf] }
  0x16   : > { %359 = vperm.xlu0 %2786, %v341_v11   ;;  %v920_v17 = vld [vmem:[#allocation2 + $0x2c] sm:$0xf]  ;;  %v811_v28 = vld [vmem:[#allocation2 + $0x1c] sm:$0xf] }
  0x17   : > { %v729_v37 = vld [vmem:[#allocation2 + $0x1c] sm:$0xf]  ;;  %v727_v38 = vld [vmem:[#allocation2 + $0xc] sm:$0xf] }
  0x18   : > { %v859_v46 = vld [vmem:[#allocation2 + $0x2c] sm:$0xf]  ;;  %v351_v9 = vld [vmem:[%s2924_s29 + $0x38] sm:$0xff] }
  0x1d   : > { %730 = vrot.lane.b32.xlu2 %v553_v13, %s2799_s18  ;;  %638 = vrot.lane.b32.xlu1 %v409_v12, %s2801_s20 }
  0x1e   : > { %951 = vrot.lane.b32.xlu0 %v553_v13, %s2800_s19 }
  0x25   : > { %554 = vrot.lane.b32.xlu2 %v553_v13, %s2802_s21  ;;  %904 = vrot.lane.b32.xlu1 %v893_v15, %s2804_s23 }
  0x26   : > { %410 = vrot.lane.b32.xlu0 %v409_v12, %s2803_s22 }
  0x2d   : > { %900 = vrot.lane.b32.xlu2 %v891_v16, %s2804_s23  ;;  %929 = vrot.lane.b32.xlu1 %v920_v17, %s2804_s23 }
  0x2e   : > { %933 = vrot.lane.b32.xlu0 %v922_v14, %s2804_s23 }
  0x6f   : > { %v813_v18 = vpop.permute.xlu2 %812 }
  0x70   : > { %v814_v21 = vrot.slane %v813_v18, 4 }
  0x72   : > { %v815_v22 = vsel %vm3734_vm10, %v814_v21, %v813_v18  ;;  %v823_v23 = vunpack.c.l.b16 %v814_v21  ;;  %v824_v24 = vunpack.c.h.b16 %v814_v21 }
  0x73   : > { %v816_v25 = vunpack.c.l.b16 %v815_v22  ;;  %v817_v26 = vunpack.c.h.b16 %v815_v22 }
  0x74   : > { %vm827_vm11 = vcmp.ne.s32.totalorder %v823_v23, %v2886_v19  ;;  %vm828_vm12 = vcmp.ne.s32.totalorder %v824_v24, %v2888_v20 }
  0x75   : > { %vm820_vm13 = vcmp.ne.s32.totalorder %v816_v25, %v2886_v19  ;;  %vm821_vm14 = vcmp.ne.s32.totalorder %v817_v26, %v2888_v20  ;;  %vm2897_vm15 = vmpackc.low %vm828_vm12, %vm827_vm11  ;;  %vm3733_vm12 = vcmask 138240  }
  0x76   : > { %vm2901_vm0 = vmpackc.low %vm821_vm14, %vm820_vm13  ;;  %v831_v31 = vsel %vm2897_vm15, %v809_v27, 0  ;;  %v833_v32 = vsel %vm2897_vm15, %v811_v28, 0  ;;  %v863_v55 = vsel %vm2897_vm15, %v859_v46, 0  ;;  %vm3735_vm13 = vcmask 1039360  }
  0x77   : > { %840 = vrot.lane.b32.xlu0 %v831_v31, %s2802_s21  ;;  %v2910_v33 = vpop.permute.xlu2 %730  ;;  %844 = vrot.lane.b32.xlu2 %v833_v32, %s2802_s21 }
  0x78   : > { %v2915_v34 = vrot.slane %v2910_v33, 4 }
  0x7a   : > { %v741_v35 = vunpack.c.l.b16 %v2915_v34  ;;  %v742_v36 = vunpack.c.h.b16 %v2915_v34 }
  0x7c   : > { %vm745_vm1 = vcmp.ne.s32.totalorder %v741_v35, %v2886_v19  ;;  %vm746_vm2 = vcmp.ne.s32.totalorder %v742_v36, %v2888_v20 }
  0x7d   : > { %vm2928_vm3 = vmpackc.low %vm746_vm2, %vm745_vm1 }
  0x7e   : > { %v751_v44 = vsel %vm2928_vm3, %v729_v37, 0  ;;  %v749_v45 = vsel %vm2928_vm3, %v727_v38, 0 }
  0x7f   : > { %762 = vrot.lane.b32.xlu0 %v751_v44, %s2801_s20  ;;  %v555_v47 = vpop.permute.xlu2 %554  ;;  %758 = vrot.lane.b32.xlu1 %v749_v45, %s2801_s20  ;;  %v373_v48 = vpop.permute.xlu1 %372 }
  0x80   : > { %v355_v49 = vpop.permute.xlu0 %354  ;;  %v556_v50 = vrot.slane %v555_v47, 4 }
  0x81   : > { %v362_v51 = vmul.f32 %v355_v49, %v344_v40  ;;  %v363_v52 = vmul.f32 %v355_v49, %v345_v41  ;;  %v366_v53 = vmul.f32 %v355_v49, %v348_v42  ;;  %v367_v54 = vmul.f32 %v355_v49, %v349_v43  ;;  %v950_v49 = vld [vmem:[#allocation2 + $0x1c] sm:$0xf] }
  0x82   : > { %v558_v56 = vsel %vm3737_vm4, %v556_v50, %v555_v47  ;;  %v566_v57 = vunpack.c.l.b16 %v556_v50  ;;  %v567_v58 = vunpack.c.h.b16 %v556_v50  ;;  %vm3738_vm4 = vcmask 7168  }
  0x83   : > { %v380_v59 = vadd.f32 %v373_v48, %v362_v51  ;;  %v381_v60 = vadd.f32 %v373_v48, %v363_v52  ;;  %v384_v61 = vadd.f32 %v373_v48, %v366_v53  ;;  %v385_v62 = vadd.f32 %v373_v48, %v367_v54  ;;  %v948_v48 = vld [vmem:[#allocation2 + $0xc] sm:$0xf] }
  0x84   : > { %v559_v63 = vunpack.c.l.b16 %v558_v56  ;;  %v560_v0 = vunpack.c.h.b16 %v558_v56  ;;  %vm570_vm5 = vcmp.ne.s32.totalorder %v566_v57, %v2886_v19  ;;  %vm571_vm6 = vcmp.ne.s32.totalorder %v567_v58, %v2888_v20 }
  0x85   : > { %v388_v1 = vmax.f32 %v380_v59, 0.0  ;;  %v389_v2 = vmax.f32 %v381_v60, 0.0  ;;  %v392_v3 = vmax.f32 %v384_v61, 0.0  ;;  %v393_v4 = vmax.f32 %v385_v62, 0.0  ;;  %vm2948_vm7 = vmpackc.low %vm571_vm6, %vm570_vm5 }
  0x86   : > { %vm563_vm8 = vcmp.ne.s32.totalorder %v559_v63, %v2886_v19  ;;  %vm564_vm9 = vcmp.ne.s32.totalorder %v560_v0, %v2888_v20 }
  0x87   : > { %v2957_v10 = vpack.c.bf16 %v389_v2, %v388_v1  ;;  %v2959_v11 = vpack.c.bf16 %v393_v4, %v392_v3  ;;  %872 = vrot.lane.b32.xlu0 %v863_v55, %s2802_s21  ;;  %vm2962_vm11 = vmpackc.low %vm564_vm9, %vm563_vm8  ;;  %v378_v13 = vpop.permute.xlu1 %377  ;;  %v861_v2 = vld [vmem:[#allocation2 + $0x3c] sm:$0xf]  ;;  %v3760_v4 = vmov 0 }
  0x88   : > { %v360_v14 = vpop.permute.xlu0 %359  ;;  %v779_v3 = vld [vmem:[#allocation2 + $0x3c] sm:$0xf] }
  0x89   : > { %400 = vst [vmem:[#allocation2 + $0x4] sm:$0xff] %v2957_v10  ;;  %v364_v15 = vmul.f32 %v360_v14, %v346_v5  ;;  %v365_v16 = vmul.f32 %v360_v14, %v347_v7  ;;  %v368_v17 = vmul.f32 %v360_v14, %v350_v8  ;;  %v369_v18 = vmul.f32 %v360_v14, %v351_v9  ;;  %v1901_v7 = vld [vmem:[#allocation2 + $0x2c] sm:$0xf] }
  0x8a   : > { %402 = vst [vmem:[#allocation2 + $0x24] sm:$0xff] %v2959_v11  ;;  %v865_v8 = vsel %vm2897_vm15, %v861_v2, 0  ;;  %v783_v9 = vsel %vm2928_vm3, %v779_v3, 0  ;;  %v733_v14 = vsel %vm3738_vm4, %v2915_v34, %v2910_v33  ;;  %v998_v3 = vld [vmem:[#allocation2 + $0x2c] sm:$0xf]  ;;  %vm3766_vm4 = vcmask 924672  }
  0x8b   : > { %v382_v21 = vadd.f32 %v378_v13, %v364_v15  ;;  %v383_v22 = vadd.f32 %v378_v13, %v365_v16  ;;  %v386_v23 = vadd.f32 %v378_v13, %v368_v17  ;;  %v387_v24 = vadd.f32 %v378_v13, %v369_v18  ;;  %720 = vst [vmem:[#allocation3 + $0x80] sm:$0xff] %v2957_v10  ;;  %v777_v15 = vld [vmem:[#allocation2 + $0x2c] sm:$0xf] }
  0x8c   : > { %v734_v16 = vunpack.c.l.b16 %v733_v14  ;;  %v735_v17 = vunpack.c.h.b16 %v733_v14  ;;  %v781_v18 = vsel %vm2928_vm3, %v777_v15, 0 }
  0x8d   : > { %v390_v25 = vmax.f32 %v382_v21, 0.0  ;;  %v391_v26 = vmax.f32 %v383_v22, 0.0  ;;  %v394_v27 = vmax.f32 %v386_v23, 0.0  ;;  %v395_v28 = vmax.f32 %v387_v24, 0.0 }
  0x8e   : > { %v830_v24 = vsel %vm2901_vm0, %v2957_v10, 0 }
  0x8f   : > { %v2969_v31 = vpack.c.bf16 %v391_v26, %v390_v25  ;;  %v2971_v32 = vpack.c.bf16 %v395_v28, %v394_v27  ;;  %v639_v36 = vpop.permute.xlu1 %638 }
  0x90   : > { %v952_v35 = vpop.permute.xlu0 %951  ;;  %v640_v38 = vrot.slane %v639_v36, 4  ;;  %v3031_v13 = vld [vmem:[#allocation2] sm:$0xff]  ;;  %v492_v34 = vld [vmem:[#allocation2 + $0x8] sm:$0xf] }
  0x91   : > { %401 = vst [vmem:[#allocation2 + $0x14] sm:$0xff] %v2969_v31  ;;  %v953_v37 = vrot.slane %v952_v35, 4  ;;  %902 = vrot.lane.b32.xlu0 %v2969_v31, %s2804_s23  ;;  %v722_v50 = vld [vmem:[#allocation2 + $0x24] sm:$0xff] }
  0x92   : > { %403 = vst [vmem:[#allocation2 + $0x34] sm:$0xff] %v2971_v32  ;;  %v642_v43 = vsel %vm3735_vm13, %v640_v38, %v639_v36  ;;  %v650_v51 = vunpack.c.l.b16 %v640_v38  ;;  %v651_v52 = vunpack.c.h.b16 %v640_v38  ;;  %v635_v26 = vld [vmem:[#allocation2 + $0x8] sm:$0xf] }
  0x93   : > { %v954_v40 = vsel %vm3733_vm12, %v953_v37, %v952_v35  ;;  %v962_v41 = vunpack.c.l.b16 %v953_v37  ;;  %v963_v42 = vunpack.c.h.b16 %v953_v37  ;;  %v643_v46 = vunpack.c.l.b16 %v642_v43  ;;  %721 = vst [vmem:[#allocation3 + $0x90] sm:$0xff] %v2969_v31 }
  0x94   : > { %v955_v44 = vunpack.c.l.b16 %v954_v40  ;;  %v956_v45 = vunpack.c.h.b16 %v954_v40  ;;  %v644_v47 = vunpack.c.h.b16 %v642_v43  ;;  %724 = vst [vmem:[#allocation3 + $0x88] sm:$0xff] %v722_v50  ;;  %vm654_vm10 = vcmp.ne.s32.totalorder %v650_v51, %v2886_v19  ;;  %v405_v43 = vld [vmem:[#allocation2 + $0x8] sm:$0xf]  ;;  %v1000_v51 = vld [vmem:[#allocation2 + $0x3c] sm:$0xf] }
  0x95   : > { %vm966_vm14 = vcmp.ne.s32.totalorder %v962_v41, %v2886_v19  ;;  %vm967_vm1 = vcmp.ne.s32.totalorder %v963_v42, %v2888_v20  ;;  %vm647_vm8 = vcmp.ne.s32.totalorder %v643_v46, %v2886_v19  ;;  %vm655_vm13 = vcmp.ne.s32.totalorder %v651_v52, %v2888_v20 }
  0x96   : > { %vm959_vm2 = vcmp.ne.s32.totalorder %v955_v44, %v2886_v19  ;;  %vm960_vm5 = vcmp.ne.s32.totalorder %v956_v45, %v2888_v20  ;;  %vm2984_vm6 = vmpackc.low %vm967_vm1, %vm966_vm14  ;;  %vm648_vm9 = vcmp.ne.s32.totalorder %v644_v47, %v2888_v20  ;;  %vm3736_vm1 = vcmask 908288   ;;  %v549_v45 = vld [vmem:[#allocation2 + $0x8] sm:$0xf] }
  0x97   : > { %vm2990_vm12 = vmpackc.low %vm960_vm5, %vm959_vm2  ;;  %v970_v55 = vsel %vm2984_vm6, %v948_v48, 0  ;;  %v972_v56 = vsel %vm2984_vm6, %v950_v49, 0  ;;  %v574_v46 = vsel %vm2948_vm7, %v549_v45, 0  ;;  %v864_v47 = vsel %vm2901_vm0, %v2971_v32, 0  ;;  %v3115_v49 = vpop.permute.xlu2 %900 }
  0x98   : > { %vm3000_vm14 = vmpackc.low %vm648_vm9, %vm647_vm8  ;;  %v411_v58 = vpop.permute.xlu0 %410  ;;  %979 = vrot.lane.b32.xlu2 %v970_v55, %s2803_s22  ;;  %983 = vrot.lane.b32.xlu1 %v972_v56, %s2803_s22  ;;  %v494_v21 = vld [vmem:[#allocation2 + $0x18] sm:$0xf]  ;;  %v493_v23 = vld [vmem:[#allocation2 + $0x10] sm:$0xff]  ;;  %v969_v25 = vsel %vm2990_vm12, %v2957_v10, 0  ;;  %v1001_v50 = vsel %vm2990_vm12, %v2959_v11, 0  ;;  %v862_v52 = vsel %vm2901_vm0, %v2959_v11, 0 }
  0x99   : > { %vm3006_vm2 = vmpackc.low %vm655_vm13, %vm654_vm10  ;;  %v412_v60 = vrot.slane %v411_v58, 4  ;;  %927 = vrot.lane.b32.xlu0 %v2959_v11, %s2804_s23  ;;  %v723_v5 = vld [vmem:[#allocation2 + $0x34] sm:$0xff]  ;;  %v659_v35 = vsel %vm3000_vm14, %v493_v23, 0  ;;  %v657_v36 = vsel %vm3000_vm14, %v3031_v13, 0  ;;  %v1004_v56 = vsel %vm2984_vm6, %v1000_v51, 0 }
  0x9a   : > { %725 = vst [vmem:[#allocation3 + $0x98] sm:$0xff] %v723_v5  ;;  %v658_v27 = vsel %vm3006_vm2, %v635_v26, 0  ;;  %v637_v38 = vld [vmem:[#allocation2 + $0x18] sm:$0xf]  ;;  %v603_v5 = vld [vmem:[#allocation2 + $0x28] sm:$0xf] }
  0x9b   : > { %v414_v61 = vsel %vm3736_vm1, %v412_v60, %v411_v58  ;;  %v422_v62 = vunpack.c.l.b16 %v412_v60  ;;  %v423_v63 = vunpack.c.h.b16 %v412_v60  ;;  %v551_v40 = vld [vmem:[#allocation2 + $0x18] sm:$0xf]  ;;  %v660_v41 = vsel %vm3006_vm2, %v637_v38, 0  ;;  %v687_v26 = vld [vmem:[#allocation2 + $0x28] sm:$0xf] }
  0x9c   : > { %v415_v0 = vunpack.c.l.b16 %v414_v61  ;;  %v416_v1 = vunpack.c.h.b16 %v414_v61  ;;  %v576_v42 = vsel %vm2948_vm7, %v551_v40, 0  ;;  %v905_v61 = vpop.permute.xlu1 %904  ;;  %v607_v15 = vsel %vm2948_vm7, %v603_v5, 0 }
  0x9d   : > { %vm426_vm5 = vcmp.ne.s32.totalorder %v422_v62, %v2886_v19  ;;  %vm427_vm8 = vcmp.ne.s32.totalorder %v423_v63, %v2888_v20  ;;  %v3138_v62 = vld [vmem:[#allocation2 + $0x30] sm:$0xff] }
  0x9e   : > { %vm419_vm10 = vcmp.ne.s32.totalorder %v415_v0, %v2886_v19  ;;  %vm420_vm13 = vcmp.ne.s32.totalorder %v416_v1, %v2888_v20  ;;  %vm3017_vm9 = vmpackc.low %vm427_vm8, %vm426_vm5  ;;  %vm738_vm5 = vcmp.ne.s32.totalorder %v734_v16, %v2886_v19  ;;  %vm739_vm8 = vcmp.ne.s32.totalorder %v735_v17, %v2888_v20 }
  0x9f   : > { %v3761_v4 = vsel %vm3017_vm9, 4294967295, %v3760_v4  ;;  %vm3021_vm1 = vmpackc.low %vm420_vm13, %vm419_vm10  ;;  %v832_v19 = vsel %vm2901_vm0, %v2969_v31, 0  ;;  %v971_v20 = vsel %vm2990_vm12, %v2969_v31, 0  ;;  %v430_v44 = vsel %vm3017_vm9, %v405_v43, 0 }
  0xa0   : > { %876 = vrot.lane.b32.xlu2 %v865_v8, %s2802_s21  ;;  %794 = vrot.lane.b32.xlu1 %v783_v9, %s2801_s20  ;;  %vm3046_vm10 = vmpackc.low %vm739_vm8, %vm738_vm5  ;;  %v3113_v48 = vpop.permute.xlu0 %933  ;;  %v431_v63 = vsel %vm3021_vm1, %v493_v23, 0  ;;  %v692_v0 = vsel %vm3000_vm14, %v3138_v62, 0  ;;  %v407_v8 = vld [vmem:[#allocation2 + $0x18] sm:$0xf]  ;;  %vm449_vm13 = vcmask 1043456   ;;  %vm3739_vm5 = vcmask 916480  }
  0xa1   : > { %499 = vrot.lane.b32.xlu0 %v3031_v13, %s2805_s30  ;;  %v748_v22 = vsel %vm3046_vm10, %v2957_v10, 0  ;;  %v750_v28 = vsel %vm3046_vm10, %v2969_v31, 0  ;;  %v573_v31 = vsel %vm2962_vm11, %v3031_v13, 0  ;;  %v782_v37 = vsel %vm3046_vm10, %v2971_v32, 0 }
  0xa2   : > { %v780_v55 = vsel %vm3046_vm10, %v2959_v11, 0  ;;  %v429_v11 = vsel %vm3021_vm1, %v3031_v13, 0  ;;  %v1002_v13 = vsel %vm2984_vm6, %v998_v3, 0  ;;  %v432_v14 = vsel %vm3017_vm9, %v407_v8, 0 }
  0xa3   : > { %vm512_vm8 = vcmask 130048  }
  0xa4   : > { %v930_v9 = vpop.permute.xlu1 %929 }
  0xa8   : > { %790 = vrot.lane.b32.xlu2 %v781_v18, %s2801_s20  ;;  %898 = vrot.lane.b32.xlu1 %v2957_v10, %s2804_s23  ;;  %v575_v10 = vsel %vm2962_vm11, %v493_v23, 0  ;;  %v3168_v18 = vld [vmem:[#allocation2 + $0x20] sm:$0xff] }
  0xa9   : > { %505 = vrot.lane.b32.xlu0 %v494_v21, %s2805_s30  ;;  %v690_v21 = vsel %vm3000_vm14, %v3168_v18, 0 }
  0xb0   : > { %931 = vrot.lane.b32.xlu2 %v2971_v32, %s2804_s23  ;;  %501 = vrot.lane.b32.xlu1 %v492_v34, %s2805_s30  ;;  %v1003_v34 = vsel %vm2990_vm12, %v2971_v32, 0 }
  0xb1   : > { %756 = vrot.lane.b32.xlu0 %v748_v22, %s2801_s20 }
  0xb8   : > { %503 = vrot.lane.b32.xlu2 %v493_v23, %s2805_s30  ;;  %842 = vrot.lane.b32.xlu1 %v832_v19, %s2802_s21 }
  0xb9   : > { %981 = vrot.lane.b32.xlu0 %v971_v20, %s2803_s22  ;;  %v909_v20 = vrot.slane %v905_v61, 4  ;;  %v1373_v61 = vld [vmem:[%s3729_s5 + $0x8] sm:$0xff] }
  0xc0   : > { %838 = vrot.lane.b32.xlu2 %v830_v24, %s2802_s21  ;;  %977 = vrot.lane.b32.xlu1 %v969_v25, %s2803_s22  ;;  %v689_v24 = vld [vmem:[#allocation2 + $0x38] sm:$0xf] }
  0xc1   : > { %667 = vrot.lane.b32.xlu0 %v658_v27, %s2799_s18  ;;  %v693_v27 = vsel %vm3006_vm2, %v689_v24, 0 }
  0xc8   : > { %760 = vrot.lane.b32.xlu2 %v750_v28, %s2801_s20  ;;  %669 = vrot.lane.b32.xlu1 %v659_v35, %s2799_s18  ;;  %v691_v28 = vsel %vm3006_vm2, %v687_v26, 0 }
  0xc9   : > { %585 = vrot.lane.b32.xlu0 %v575_v10, %s2798_s17  ;;  %v523_v10 = vld [vmem:[#allocation2 + $0x38] sm:$0xf] }
  0xd0   : > { %665 = vrot.lane.b32.xlu2 %v657_v36, %s2799_s18  ;;  %581 = vrot.lane.b32.xlu1 %v573_v31, %s2798_s17 }
  0xd1   : > { %792 = vrot.lane.b32.xlu0 %v782_v37, %s2801_s20  ;;  %v3136_v60 = vpop.permute.xlu2 %844  ;;  %v938_v37 = vrot.slane %v3113_v48, 4 }
  0xd8   : > { %671 = vrot.lane.b32.xlu2 %v660_v41, %s2799_s18  ;;  %587 = vrot.lane.b32.xlu1 %v576_v42, %s2798_s17  ;;  %v936_v41 = vrot.slane %v930_v9, 4 }
  0xd9   : > { %439 = vrot.lane.b32.xlu0 %v430_v44, %s2800_s19 }
  0xe0   : > { %583 = vrot.lane.b32.xlu2 %v574_v46, %s2798_s17  ;;  %874 = vrot.lane.b32.xlu1 %v864_v47, %s2802_s21  ;;  %v608_v46 = vsel %vm2962_vm11, %v3138_v62, 0  ;;  %v606_v47 = vsel %vm2962_vm11, %v3168_v18, 0 }
  0xe1   : > { %1009 = vrot.lane.b32.xlu0 %v1001_v50, %s2803_s22  ;;  %v465_v50 = vsel %vm3021_vm1, %v3138_v62, 0 }
  0xe8   : > { %870 = vrot.lane.b32.xlu2 %v862_v52, %s2802_s21  ;;  %788 = vrot.lane.b32.xlu1 %v780_v55, %s2801_s20 }
  0xe9   : > { %v3133_v58 = vpop.permute.xlu0 %840  ;;  %1015 = vrot.lane.b32.xlu0 %v1004_v56, %s2803_s22  ;;  %v605_v56 = vld [vmem:[#allocation2 + $0x38] sm:$0xf] }
  0xf0   : > { %441 = vrot.lane.b32.xlu1 %v431_v63, %s2800_s19  ;;  %437 = vrot.lane.b32.xlu2 %v429_v11, %s2800_s19  ;;  %v521_v11 = vld [vmem:[#allocation2 + $0x28] sm:$0xf] }
  0xf1   : > { %v3150_v1 = vpop.permute.xlu0 %762  ;;  %702 = vrot.lane.b32.xlu0 %v692_v0, %s2799_s18  ;;  %v3178_v22 = vpop.permute.xlu1 %758  ;;  %v609_v0 = vsel %vm2948_vm7, %v605_v56, 0 }
  0xf2   : > { %v3153_v2 = vpop.permute.xlu2 %979 }
  0xf8   : > { %1011 = vrot.lane.b32.xlu1 %v1002_v13, %s2803_s22  ;;  %443 = vrot.lane.b32.xlu2 %v432_v14, %s2800_s19  ;;  %v907_v13 = vrot.slane %v3115_v49, 4  ;;  %v847_v14 = vrot.slane %v3133_v58, 4  ;;  %v463_v49 = vsel %vm3021_vm1, %v3168_v18, 0 }
  0xf9   : > { %v3163_v16 = vpop.permute.xlu0 %872  ;;  %616 = vrot.lane.b32.xlu0 %v607_v15, %s2798_s17 }
  0xfa   : > { %v3166_v17 = vpop.permute.xlu2 %876 }
 0x100   : > { %698 = vrot.lane.b32.xlu1 %v690_v21, %s2799_s18  ;;  %1013 = vrot.lane.b32.xlu2 %v1003_v34, %s2803_s22 }
 0x101   : > { %528 = vrot.lane.b32.xlu0 %v3168_v18, %s2805_s30  ;;  %v765_v18 = vrot.slane %v3178_v22, 4 }
 0x102   : > { %v3182_v23 = vpop.permute.xlu2 %790 }
 0x103   : > { %v903_v19 = vpop.permute.xlu0 %902 }
 0x104   : > { %v908_v25 = vrot.slane %v903_v19, 4 }
 0x106   : > { %v913_v32 = vsel %vm449_vm13, %v908_v25, %v909_v20 }
 0x107   : > { %v914_v35 = vsel %vm3739_vm5, %v903_v19, %v913_v32 }
 0x108   : > { %704 = vrot.lane.b32.xlu1 %v693_v27, %s2799_s18  ;;  %700 = vrot.lane.b32.xlu2 %v691_v28, %s2799_s18  ;;  %918 = vst [vmem:[#allocation3 + $0xf0] sm:$0xff] %v914_v35  ;;  %v1815_v28 = vld [vmem:[#allocation2 + $0x1c] sm:$0xf] }
 0x109   : > { %534 = vrot.lane.b32.xlu0 %v523_v10, %s2805_s30 }
 0x10a   : > { %v3193_v36 = vpop.permute.xlu1 %983  ;;  %v932_v31 = vpop.permute.xlu2 %931 }
 0x10b   : > { %v937_v38 = vrot.slane %v932_v31, 4  ;;  %v928_v40 = vpop.permute.xlu0 %927 }
 0x10c   : > { %v935_v42 = vrot.slane %v928_v40, 4 }
 0x10d   : > { %v941_v43 = vsel %vm449_vm13, %v937_v38, %v938_v37 }
 0x10e   : > { %v942_v44 = vsel %vm3739_vm5, %v932_v31, %v941_v43  ;;  %v939_v45 = vsel %vm449_vm13, %v935_v42, %v936_v41  ;;  %v767_v31 = vrot.slane %v3150_v1, 4 }
 0x10f   : > { %946 = vst [vmem:[#allocation3 + $0xf8] sm:$0xff] %v942_v44  ;;  %v940_v48 = vsel %vm3739_vm5, %v928_v40, %v939_v45  ;;  %v460_v45 = vld [vmem:[#allocation2 + $0x28] sm:$0xf]  ;;  %v2725_v1 = vld [vmem:[#allocation3 + $0xec] sm:$0xf0] }
 0x110   : > { %618 = vrot.lane.b32.xlu1 %v608_v46, %s2798_s17  ;;  %614 = vrot.lane.b32.xlu2 %v606_v47, %s2798_s17  ;;  %945 = vst [vmem:[#allocation3 + $0xe8] sm:$0xff] %v940_v48  ;;  %v462_v48 = vld [vmem:[#allocation2 + $0x38] sm:$0xf]  ;;  %v464_v56 = vsel %vm3017_vm9, %v460_v45, 0  ;;  %v1751_v45 = vld [vmem:[#allocation2 + $0x1c] sm:$0xf] }
 0x111   : > { %475 = vrot.lane.b32.xlu0 %v465_v50, %s2800_s19  ;;  %v466_v22 = vsel %vm3017_vm9, %v462_v48, 0  ;;  %vm3776_vm9 = vcmask 1039360  }
 0x112   : > { %v3212_v51 = vpop.permute.xlu1 %794  ;;  %v504_v52 = vpop.permute.xlu2 %503 }
 0x113   : > { %v500_v55 = vpop.permute.xlu0 %499  ;;  %v509_v19 = vrot.slane %v504_v52, 4 }
 0x114   : > { %v507_v37 = vrot.slane %v500_v55, 4 }
 0x116   : > { %v2726_v63 = vld [vmem:[#allocation3 + $0xf4] sm:$0xf0] }
 0x117   : > { %v2499_v3 = vld [vmem:[#allocation3 + $0xe8] sm:$0xf] }
 0x118   : > { %530 = vrot.lane.b32.xlu1 %v521_v11, %s2805_s30  ;;  %620 = vrot.lane.b32.xlu2 %v609_v0, %s2798_s17  ;;  %v2500_v5 = vor.u32 %v2726_v63, %v2499_v3  ;;  %v849_v3 = vrot.slane %v3136_v60, 4 }
 0x119   : > { %1381 = vperm.xlu0 %2786, %v1373_v61  }
 0x11a   : > { %v899_v8 = vpop.permute.xlu1 %898  ;;  %v839_v9 = vpop.permute.xlu2 %838  ;;  %1316 = vmatpush.bf16.msra.mxu1 %v2500_v5 }
 0x11b   : > { %v906_v15 = vrot.slane %v899_v8, 4  ;;  %v846_v21 = vrot.slane %v839_v9, 4  ;;  %v506_v34 = vpop.permute.xlu0 %505 }
 0x11c   : > { %v510_v20 = vrot.slane %v506_v34, 4  ;;  %v1869_v34 = vld [vmem:[#allocation2 + $0xc] sm:$0xf] }
 0x11d   : > { %v910_v24 = vsel %vm449_vm13, %v906_v15, %v907_v13  ;;  %v850_v25 = vsel %vm449_vm13, %v846_v21, %v847_v14  ;;  %v1392_v15 = vld [vmem:[%s3730_s6] sm:$0xff] }
 0x11e   : > { %v912_v26 = vsel %vm3739_vm5, %v899_v8, %v910_v24  ;;  %v851_v32 = vsel %vm3766_vm4, %v839_v9, %v850_v25  ;;  %v514_v27 = vsel %vm449_vm13, %v509_v19, %v510_v20  ;;  %vm3767_vm4 = vcmask 1039360   ;;  %v1372_v21 = vld [vmem:[%s3729_s5] sm:$0xff] }
 0x11f   : > { %917 = vst [vmem:[#allocation3 + $0xe0] sm:$0xff] %v912_v26  ;;  %v515_v58 = vsel %vm512_vm8, %v504_v52, %v514_v27  ;;  %vm3768_vm5 = vmmov %vm3767_vm4  ;;  %v988_v9 = vrot.slane %v3193_v36, 4  ;;  %v1873_v36 = vsel %vm2984_vm6, %v1869_v34, 0  ;;  %v986_v26 = vrot.slane %v3153_v2, 4 }
 0x120   : > { %856 = vst [vmem:[#allocation3 + $0xc0] sm:$0xff] %v851_v32  ;;  %471 = vrot.lane.b32.xlu1 %v463_v49, %s2800_s19  ;;  %532 = vrot.lane.b32.xlu2 %v3138_v62, %s2805_s30  ;;  %v1685_v62 = vld [vmem:[#allocation2 + $0xc] sm:$0xf] }
 0x121   : > { %519 = vst [vmem:[#allocation3 + $0x30] sm:$0xff] %v515_v58  ;;  %1826 = vrot.lane.b32.xlu0 %v1815_v28, %s2804_s23 }
 0x122   : > { %v761_v35 = vpop.permute.xlu2 %760  ;;  %v502_v10 = vpop.permute.xlu1 %501 }
 0x123   : > { %v766_v38 = vrot.slane %v761_v35, 4  ;;  %v508_v40 = vrot.slane %v502_v10, 4  ;;  %v757_v41 = vpop.permute.xlu0 %756  ;;  %v1393_v10 = vld [vmem:[%s3730_s6 + $0x8] sm:$0xff] }
 0x124   : > { %v764_v42 = vrot.slane %v757_v41, 4 }
 0x125   : > { %v770_v43 = vsel %vm449_vm13, %v766_v38, %v767_v31  ;;  %v511_v44 = vsel %vm449_vm13, %v507_v37, %v508_v40  ;;  %v1719_v31 = vld [vmem:[#allocation2 + $0x3c] sm:$0xf] }
 0x126   : > { %v771_v46 = vsel %vm3767_vm4, %v761_v35, %v770_v43  ;;  %v513_v47 = vsel %vm512_vm8, %v500_v55, %v511_v44  ;;  %v2491_v50 = vld [vmem:[#allocation3 + $0xe0] sm:$0xf]  ;;  %v768_v52 = vsel %vm449_vm13, %v764_v42, %v765_v18  ;;  %v1689_v55 = vsel %vm2928_vm3, %v1685_v62, 0  ;;  %v1813_v35 = vld [vmem:[#allocation2 + $0xc] sm:$0xf] }
 0x127   : > { %775 = vst [vmem:[#allocation3 + $0xb0] sm:$0xff] %v771_v46  ;;  %v2492_v61 = vor.u32 %v2725_v1, %v2491_v50  ;;  %v769_v63 = vsel %vm3768_vm5, %v757_v41, %v768_v52  ;;  %vm3769_vm5 = vcmask 924672   ;;  %vm3770_vm4 = vcmask 908288   ;;  %v2475_v38 = vld [vmem:[#allocation3 + $0xc0] sm:$0xf] }
 0x128   : > { %518 = vst [vmem:[#allocation3 + $0x20] sm:$0xff] %v513_v47  ;;  %477 = vrot.lane.b32.xlu1 %v466_v22, %s2800_s19  ;;  %473 = vrot.lane.b32.xlu2 %v464_v56, %s2800_s19  ;;  %v1723_v44 = vsel %vm2928_vm3, %v1719_v31, 0  ;;  %v1755_v52 = vsel %vm2897_vm15, %v1751_v45, 0  ;;  %v1749_v22 = vld [vmem:[#allocation2 + $0xc] sm:$0xf] }
 0x129   : > { %1260 = vmatpush.bf16.msra.mxu0 %v2492_v61  ;;  %774 = vst [vmem:[#allocation3 + $0xa0] sm:$0xff] %v769_v63  ;;  %1698 = vrot.lane.b32.xlu0 %v1689_v55, %s2801_s20  ;;  %v2713_v56 = vld [vmem:[#allocation3 + $0x8c] sm:$0xf0]  ;;  %v2443_v63 = vld [vmem:[#allocation3 + $0x80] sm:$0xf] }
 0x12a   : > { %v666_v11 = vpop.permute.xlu2 %665  ;;  %v843_v0 = vpop.permute.xlu1 %842  ;;  %v1687_v31 = vld [vmem:[#allocation2 + $0x1c] sm:$0xf]  ;;  %v2397_v39 = vld [vmem:[#allocation3 + $0x30] sm:$0xf0] }
 0x12b   : > { %v848_v5 = vrot.slane %v843_v0, 4  ;;  %v982_v8 = vpop.permute.xlu0 %981  ;;  %v673_v28 = vrot.slane %v666_v11, 4  ;;  %v1691_v45 = vsel %vm2928_vm3, %v1687_v31, 0 }
 0x12c   : > { %v987_v13 = vrot.slane %v982_v8, 4 }
 0x12d   : > { %v852_v14 = vsel %vm449_vm13, %v848_v5, %v849_v3 }
 0x12e   : > { %v853_v19 = vsel %vm3769_vm5, %v843_v0, %v852_v14  ;;  %v991_v60 = vsel %vm449_vm13, %v987_v13, %v988_v9  ;;  %vm3771_vm5 = vmmov %vm3770_vm4  ;;  %v2717_v43 = vld [vmem:[#allocation3 + $0xac] sm:$0xf0]  ;;  %v1753_v9 = vsel %vm2897_vm15, %v1749_v22, 0  ;;  %v2444_v13 = vor.u32 %v2713_v56, %v2443_v63  ;;  %v2711_v63 = vld [vmem:[#allocation3 + $0x84] sm:$0xf] }
 0x12f   : > { %857 = vst [vmem:[#allocation3 + $0xd0] sm:$0xff] %v853_v19  ;;  %v992_v20 = vsel %vm3770_vm4, %v982_v8, %v991_v60  ;;  %vm3772_vm4 = vcmask 7168   ;;  %v2693_v19 = vld [vmem:[%s3728_s4 + $0x4] sm:$0xf]  ;;  %v2373_v60 = vld [vmem:[%s3728_s4 + $0x8] sm:$0xf0] }
 0x130   : > { %1396 = vperm.xlu1 %2787, %v1392_v15   ;;  %1376 = vperm.xlu2 %2788, %v1372_v21   ;;  %996 = vst [vmem:[#allocation3 + $0x110] sm:$0xff] %v992_v20  ;;  %v2459_v42 = vld [vmem:[#allocation3 + $0xa0] sm:$0xf]  ;;  %v2493_v21 = vld [vmem:[#allocation3 + $0xf0] sm:$0xf0] }
 0x131   : > { %1882 = vrot.lane.b32.xlu0 %v1873_v36, %s2803_s22  ;;  %v2460_v50 = vor.u32 %v2717_v43, %v2459_v42  ;;  %v3296_v36 = vor.u32 %v2693_v19, %v2373_v60 }
 0x132   : > { %v672_v24 = vpop.permute.xlu2 %671  ;;  %v978_v25 = vpop.permute.xlu1 %977 }
 0x133   : > { %v985_v32 = vrot.slane %v978_v25, 4  ;;  %v668_v27 = vpop.permute.xlu0 %667  ;;  %v676_v47 = vrot.slane %v672_v24, 4 }
 0x134   : > { %v674_v49 = vrot.slane %v668_v27, 4 }
 0x135   : > { %v989_v58 = vsel %vm449_vm13, %v985_v32, %v986_v26  ;;  %v879_v26 = vrot.slane %v3163_v16, 4  ;;  %v2461_v16 = vld [vmem:[#allocation3 + $0xb0] sm:$0xf0] }
 0x136   : > { %v990_v37 = vsel %vm3771_vm5, %v978_v25, %v989_v58  ;;  %v2721_v40 = vld [vmem:[#allocation3 + $0xcc] sm:$0xf0]  ;;  %v677_v41 = vsel %vm449_vm13, %v673_v28, %v674_v49  ;;  %vm3773_vm5 = vmmov %vm3772_vm4  ;;  %v2477_v20 = vld [vmem:[#allocation3 + $0xd0] sm:$0xf0] }
 0x137   : > { %995 = vst [vmem:[#allocation3 + $0x100] sm:$0xff] %v990_v37  ;;  %v2476_v2 = vor.u32 %v2721_v40, %v2475_v38  ;;  %v679_v18 = vsel %vm3772_vm4, %v666_v11, %v677_v41  ;;  %v2729_v55 = vld [vmem:[#allocation3 + $0x10c] sm:$0xf0]  ;;  %v2723_v11 = vld [vmem:[#allocation3 + $0xe4] sm:$0xf]  ;;  %vm3774_vm4 = vcmask 924672  }
 0x138   : > { %1822 = vrot.lane.b32.xlu1 %v1813_v35, %s2804_s23  ;;  %1401 = vperm.xlu2 %2788, %v1393_v10   ;;  %684 = vst [vmem:[#allocation3 + $0x60] sm:$0xff] %v679_v18  ;;  %v2509_v8 = vld [vmem:[#allocation3 + $0x110] sm:$0xf0]  ;;  %v2496_v34 = vor.u32 %v2723_v11, %v2493_v21  ;;  %v2719_v49 = vld [vmem:[#allocation3 + $0xc4] sm:$0xf]  ;;  %v799_v35 = vrot.slane %v3212_v51, 4 }
 0x139   : > { %1261 = vmatpush.bf16.msra.mxu0 %v2476_v2  ;;  %1734 = vrot.lane.b32.xlu0 %v1723_v44, %s2801_s20  ;;  %v2480_v10 = vor.u32 %v2719_v49, %v2477_v20  ;;  %v1843_v41 = vld [vmem:[#allocation2 + $0x3c] sm:$0xf]  ;;  %v2715_v2 = vld [vmem:[#allocation3 + $0xa4] sm:$0xf] }
 0x13a   : > { %v584_v62 = vpop.permute.xlu2 %583  ;;  %v670_v46 = vpop.permute.xlu1 %669 }
 0x13b   : > { %v675_v48 = vrot.slane %v670_v46, 4  ;;  %v3280_v1 = vpop.permute.xlu0 %585  ;;  %v590_v32 = vrot.slane %v584_v62, 4 }
 0x13c   : > { %v591_v22 = vrot.slane %v3280_v1, 4 }
 0x13d   : > { %v680_v61 = vsel %vm449_vm13, %v675_v48, %v676_v47  ;;  %1262 = vmatpush.bf16.msra.mxu0 %v2460_v50  ;;  %v2464_v47 = vor.u32 %v2715_v2, %v2461_v16  ;;  %v2445_v48 = vld [vmem:[#allocation3 + $0x90] sm:$0xf0]  ;;  %v797_v2 = vrot.slane %v3182_v23, 4 }
 0x13e   : > { %v681_v0 = vsel %vm3773_vm5, %v670_v46, %v680_v61  ;;  %v2507_v3 = vld [vmem:[#allocation3 + $0x100] sm:$0xf]  ;;  %v2727_v5 = vld [vmem:[#allocation3 + $0x104] sm:$0xf]  ;;  %vm3775_vm5 = vcmask 121856   ;;  %v2448_v11 = vor.u32 %v2711_v63, %v2445_v48 }
 0x13f   : > { %685 = vst [vmem:[#allocation3 + $0x70] sm:$0xff] %v681_v0  ;;  %v2508_v14 = vor.u32 %v2729_v55, %v2507_v3  ;;  %v2512_v15 = vor.u32 %v2727_v5, %v2509_v8  ;;  %v2427_v42 = vld [vmem:[#allocation3 + $0x60] sm:$0xf]  ;;  %v1783_v0 = vld [vmem:[#allocation2 + $0x3c] sm:$0xf] }
 0x140   : > { %1766 = vrot.lane.b32.xlu1 %v1755_v52, %s2802_s21  ;;  %1762 = vrot.lane.b32.xlu2 %v1753_v9, %s2802_s21  ;;  %v1841_v8 = vld [vmem:[#allocation2 + $0x2c] sm:$0xf]  ;;  %v2707_v21 = vld [vmem:[#allocation3 + $0x64] sm:$0xf] }
 0x141   : > { %1263 = vmatpush.bf16.msra.mxu0 %v2444_v13  ;;  %1281 = vmatpush.bf16.msra.mxu2 %v2508_v14 }
 0x142   : > { %v871_v24 = vpop.permute.xlu2 %870  ;;  %v582_v25 = vpop.permute.xlu1 %581  ;;  %1309 = vmatpush.bf16.msra.mxu3 %v2512_v15  ;;  %v1787_v15 = vsel %vm2897_vm15, %v1783_v0, 0 }
 0x143   : > { %v878_v27 = vrot.slane %v871_v24, 4  ;;  %v589_v28 = vrot.slane %v582_v25, 4  ;;  %v793_v58 = vpop.permute.xlu0 %792 }
 0x144   : > { %v798_v37 = vrot.slane %v793_v58, 4  ;;  %2521 = vmatmul.msk.bf16.vlgmr.msra.gmra.mxu2 %vm512_vm8, %v3296_v36 }
 0x145   : > { %1288 = vmatpush.bf16.msrb.mxu2 %v2496_v34  ;;  %v882_v38 = vsel %vm449_vm13, %v878_v27, %v879_v26  ;;  %v593_v40 = vsel %vm449_vm13, %v589_v28, %v590_v32  ;;  %2522 = vmatmul.msk.bf16.vlgmr.msra.gmra.mxu3 %vm512_vm8, %v3296_v36  ;;  %v1717_v26 = vld [vmem:[#allocation2 + $0x2c] sm:$0xf]  ;;  %v1871_v32 = vld [vmem:[#allocation2 + $0x1c] sm:$0xf] }
 0x146   : > { %v883_v18 = vsel %vm3774_vm4, %v871_v24, %v882_v38  ;;  %v595_v51 = vsel %vm3775_vm5, %v582_v25, %v593_v40  ;;  %v2709_v43 = vld [vmem:[#allocation3 + $0x6c] sm:$0xf0]  ;;  %v802_v44 = vsel %vm449_vm13, %v798_v37, %v799_v35  ;;  %v2429_v9 = vld [vmem:[#allocation3 + $0x70] sm:$0xf0]  ;;  %vm3778_vm4 = vcmask 138240  }
 0x147   : > { %888 = vst [vmem:[#allocation3 + $0xc8] sm:$0xff] %v883_v18  ;;  %v2428_v62 = vor.u32 %v2709_v43, %v2427_v42  ;;  %v803_v46 = vsel %vm3776_vm9, %v793_v58, %v802_v44  ;;  %vm3777_vm9 = vmmov %vm3775_vm5  ;;  %v2432_v19 = vor.u32 %v2707_v21, %v2429_v9  ;;  %vm3779_vm5 = vcmask 924672   ;;  %v2395_v40 = vld [vmem:[#allocation3 + $0x20] sm:$0xf] }
 0x148   : > { %600 = vst [vmem:[#allocation3 + $0x40] sm:$0xff] %v595_v51  ;;  %1854 = vrot.lane.b32.xlu1 %v1843_v41, %s2804_s23  ;;  %1702 = vrot.lane.b32.xlu2 %v1691_v45, %s2801_s20  ;;  %v1721_v31 = vsel %vm2928_vm3, %v1717_v26, 0  ;;  %v2699_v41 = vld [vmem:[#allocation3 + $0x24] sm:$0xf]  ;;  %v2701_v51 = vld [vmem:[#allocation3 + $0x2c] sm:$0xf0] }
 0x149   : > { %1289 = vmatpush.bf16.msrb.mxu2 %v2480_v10  ;;  %1264 = vmatpush.bf16.msra.mxu0 %v2428_v62  ;;  %807 = vst [vmem:[#allocation3 + $0xb8] sm:$0xff] %v803_v46  ;;  %v2396_v44 = vor.u32 %v2701_v51, %v2395_v40  ;;  %v2400_v45 = vor.u32 %v2699_v41, %v2397_v39  ;;  %v1781_v46 = vld [vmem:[#allocation2 + $0x2c] sm:$0xf]  ;;  %vm3780_vm3 = vcmask 1039360  }
 0x14a   : > { %v588_v50 = vpop.permute.xlu1 %587  ;;  %v438_v52 = vpop.permute.xlu2 %437 }
 0x14b   : > { %v592_v56 = vrot.slane %v588_v50, 4  ;;  %v445_v61 = vrot.slane %v438_v52, 4  ;;  %v440_v55 = vpop.permute.xlu0 %439 }
 0x14c   : > { %v446_v3 = vrot.slane %v440_v55, 4 }
 0x14d   : > { %1290 = vmatpush.bf16.msrb.mxu2 %v2464_v47  ;;  %v596_v5 = vsel %vm449_vm13, %v591_v22, %v592_v56  ;;  %v1785_v56 = vsel %vm2897_vm15, %v1781_v46, 0 }
 0x14e   : > { %v597_v13 = vsel %vm3777_vm9, %v3280_v1, %v596_v5  ;;  %v450_v14 = vsel %vm449_vm13, %v445_v61, %v446_v3  ;;  %v881_v1 = vrot.slane %v3166_v17, 4  ;;  %v1875_v17 = vsel %vm2984_vm6, %v1871_v32, 0 }
 0x14f   : > { %601 = vst [vmem:[#allocation3 + $0x50] sm:$0xff] %v597_v13  ;;  %v452_v34 = vsel %vm3778_vm4, %v438_v52, %v450_v14  ;;  %v2411_v28 = vld [vmem:[#allocation3 + $0x40] sm:$0xf]  ;;  %v2703_v35 = vld [vmem:[#allocation3 + $0x44] sm:$0xf]  ;;  %vm3781_vm9 = vcmask 908288  }
 0x150   : > { %1798 = vrot.lane.b32.xlu1 %v1787_v15, %s2802_s21  ;;  %1850 = vrot.lane.b32.xlu2 %v1841_v8, %s2804_s23  ;;  %457 = vst [vmem:[#allocation3] sm:$0xff] %v452_v34  ;;  %v2483_v52 = vld [vmem:[#allocation3 + $0xc8] sm:$0xf]  ;;  %v2718_v29 = vld [vmem:[#allocation3 + $0xb4] sm:$0xf0]  ;;  %vm3782_vm15 = vmmov %vm3781_vm9 }
 0x151   : > { %1291 = vmatpush.bf16.msrb.mxu2 %v2448_v11  ;;  %v2714_v15 = vld [vmem:[#allocation3 + $0x94] sm:$0xf0] }
 0x152   : > { %v875_v60 = vpop.permute.xlu1 %874  ;;  %v444_v20 = vpop.permute.xlu2 %443 }
 0x153   : > { %v880_v24 = vrot.slane %v875_v60, 4  ;;  %v3325_v25 = vpop.permute.xlu0 %1009  ;;  %v448_v0 = vrot.slane %v444_v20, 4 }
 0x155   : > { %1292 = vmatpush.bf16.msrb.mxu2 %v2432_v19  ;;  %v884_v27 = vsel %vm449_vm13, %v880_v24, %v881_v1  ;;  %v2451_v19 = vld [vmem:[#allocation3 + $0x88] sm:$0xf] }
 0x156   : > { %v885_v49 = vsel %vm3779_vm5, %v875_v60, %v884_v27  ;;  %v2705_v58 = vld [vmem:[#allocation3 + $0x4c] sm:$0xf0]  ;;  %v2413_v10 = vld [vmem:[#allocation3 + $0x50] sm:$0xf0]  ;;  %v1017_v60 = vrot.slane %v3325_v25, 4  ;;  %v2452_v24 = vor.u32 %v2714_v15, %v2451_v19  ;;  %vm3783_vm5 = vcmask 121856  }
 0x157   : > { %889 = vst [vmem:[#allocation3 + $0xd8] sm:$0xff] %v885_v49  ;;  %v2412_v37 = vor.u32 %v2705_v58, %v2411_v28  ;;  %v2416_v38 = vor.u32 %v2703_v35, %v2413_v10  ;;  %v2379_v28 = vld [vmem:[#allocation3] sm:$0xf]  ;;  %v2694_v58 = vld [vmem:[%s3728_s4 + $0x4] sm:$0xf0] }
 0x158   : > { %1730 = vrot.lane.b32.xlu1 %v1721_v31, %s2801_s20  ;;  %1886 = vrot.lane.b32.xlu2 %v1875_v17, %s2803_s22  ;;  %v2371_v49 = vld [vmem:[%s3728_s4] sm:$0xf]  ;;  %v2695_v31 = vld [vmem:[#allocation3 + $0x4] sm:$0xf] }
 0x159   : > { %1265 = vmatpush.bf16.msra.mxu0 %v2412_v37  ;;  %1293 = vmatpush.bf16.msrb.mxu2 %v2416_v38 }
 0x15a   : > { %v789_v16 = vpop.permute.xlu1 %788  ;;  %v1014_v18 = vpop.permute.xlu2 %1013 }
 0x15b   : > { %v796_v42 = vrot.slane %v789_v16, 4  ;;  %v1019_v43 = vrot.slane %v1014_v18, 4  ;;  %v1016_v62 = vpop.permute.xlu0 %1015 }
 0x15c   : > { %v1020_v47 = vrot.slane %v1016_v62, 4 }
 0x15d   : > { %v800_v48 = vsel %vm449_vm13, %v796_v42, %v797_v2  ;;  %1266 = vmatpush.bf16.msra.mxu0 %v2396_v44  ;;  %1294 = vmatpush.bf16.msrb.mxu2 %v2400_v45  ;;  %v3359_v2 = vor.u32 %v2694_v58, %v2371_v49  ;;  %v2724_v44 = vld [vmem:[#allocation3 + $0xec] sm:$0xf]  ;;  %v2501_v45 = vld [vmem:[#allocation3 + $0xf8] sm:$0xf0] }
 0x15e   : > { %v801_v50 = vsel %vm3780_vm3, %v789_v16, %v800_v48  ;;  %v2722_v22 = vld [vmem:[#allocation3 + $0xd4] sm:$0xf0]  ;;  %v1023_v23 = vsel %vm449_vm13, %v1019_v43, %v1020_v47  ;;  %vm3784_vm3 = vcmask 7168  }
 0x15f   : > { %806 = vst [vmem:[#allocation3 + $0xa8] sm:$0xff] %v801_v50  ;;  %v2484_v61 = vor.u32 %v2722_v22, %v2483_v52  ;;  %v1024_v63 = vsel %vm3781_vm9, %v1014_v18, %v1023_v23  ;;  %v2504_v22 = vor.u32 %v2724_v44, %v2501_v45  ;;  %v2485_v23 = vld [vmem:[#allocation3 + $0xd8] sm:$0xf0]  ;;  %vm3785_vm9 = vmmov %vm3784_vm3 }
 0x160   : > { %1794 = vrot.lane.b32.xlu2 %v1785_v56, %s2802_s21  ;;  %1028 = vst [vmem:[#allocation3 + $0x118] sm:$0xff] %v1024_v63 }
 0x161   : > { %1317 = vmatpush.bf16.msra.mxu1 %v2484_v61 }
 0x162   : > { %v442_v55 = vpop.permute.xlu1 %441  ;;  %v701_v11 = vpop.permute.xlu2 %700 }
 0x163   : > { %v447_v3 = vrot.slane %v442_v55, 4  ;;  %v3343_v5 = vpop.permute.xlu0 %702  ;;  %v707_v51 = vrot.slane %v701_v11, 4 }
 0x164   : > { %v708_v63 = vrot.slane %v3343_v5, 4 }
 0x165   : > { %v453_v8 = vsel %vm449_vm13, %v447_v3, %v448_v0  ;;  %v2720_v0 = vld [vmem:[#allocation3 + $0xcc] sm:$0xf] }
 0x166   : > { %v454_v9 = vsel %vm3778_vm4, %v442_v55, %v453_v8  ;;  %v2467_v13 = vld [vmem:[#allocation3 + $0xa8] sm:$0xf]  ;;  %v2488_v8 = vor.u32 %v2720_v0, %v2485_v23  ;;  %vm3786_vm4 = vmmov %vm3783_vm5 }
 0x167   : > { %458 = vst [vmem:[#allocation3 + $0x10] sm:$0xff] %v454_v9  ;;  %v2468_v14 = vor.u32 %v2718_v29, %v2467_v13  ;;  %v2730_v43 = vld [vmem:[#allocation3 + $0x114] sm:$0xf0]  ;;  %v2517_v48 = vld [vmem:[#allocation3 + $0x118] sm:$0xf0] }
 0x168   : > { %v2716_v29 = vld [vmem:[#allocation3 + $0xac] sm:$0xf] }
 0x169   : > { %1318 = vmatpush.bf16.msra.mxu1 %v2468_v14 }
 0x16a   : > { %v1012_v21 = vpop.permute.xlu1 %1011  ;;  %v615_v34 = vpop.permute.xlu2 %614 }
 0x16b   : > { %v1018_v1 = vrot.slane %v1012_v21, 4  ;;  %v622_v20 = vrot.slane %v615_v34, 4  ;;  %v617_v26 = vpop.permute.xlu0 %616  ;;  %v2469_v21 = vld [vmem:[#allocation3 + $0xb8] sm:$0xf0] }
 0x16c   : > { %v623_v32 = vrot.slane %v617_v26, 4  ;;  %v2472_v19 = vor.u32 %v2716_v29, %v2469_v21  ;;  %v2712_v26 = vld [vmem:[#allocation3 + $0x8c] sm:$0xf] }
 0x16d   : > { %v1021_v27 = vsel %vm449_vm13, %v1017_v60, %v1018_v1  ;;  %1319 = vmatpush.bf16.msra.mxu1 %v2452_v24  ;;  %v2453_v60 = vld [vmem:[#allocation3 + $0x98] sm:$0xf0] }
 0x16e   : > { %v1022_v35 = vsel %vm3782_vm15, %v3325_v25, %v1021_v27  ;;  %v2697_v10 = vld [vmem:[#allocation3 + $0xc] sm:$0xf0]  ;;  %v2381_v17 = vld [vmem:[#allocation3 + $0x10] sm:$0xf0]  ;;  %v626_v37 = vsel %vm449_vm13, %v622_v20, %v623_v32  ;;  %v2456_v32 = vor.u32 %v2712_v26, %v2453_v60  ;;  %vm3787_vm15 = vcmask 138240  }
 0x16f   : > { %1027 = vst [vmem:[#allocation3 + $0x108] sm:$0xff] %v1022_v35  ;;  %v2380_v38 = vor.u32 %v2697_v10, %v2379_v28  ;;  %v2384_v40 = vor.u32 %v2695_v31, %v2381_v17  ;;  %v627_v41 = vsel %vm3783_vm5, %v615_v34, %v626_v37  ;;  %vm3788_vm5 = vmmov %vm3787_vm15 }
 0x170   : > { %632 = vst [vmem:[#allocation3 + $0x48] sm:$0xff] %v627_v41 }
 0x171   : > { %1267 = vmatpush.bf16.msra.mxu0 %v2380_v38  ;;  %1295 = vmatpush.bf16.msrb.mxu2 %v2384_v40 }
 0x172   : > { %v699_v16 = vpop.permute.xlu1 %698  ;;  %v621_v18 = vpop.permute.xlu2 %620 }
 0x173   : > { %v706_v39 = vrot.slane %v699_v16, 4  ;;  %v3361_v25 = vpop.permute.xlu0 %528  ;;  %v625_v20 = vrot.slane %v621_v18, 4 }
 0x174   : > { %1268 = vmatmul.bf16.vlgmr.msra.gmra.mxu0 %v3359_v2  ;;  %1296 = vmatmul.bf16.vlgmr.msrb.gmra.mxu2 %v3359_v2  ;;  %v536_v37 = vrot.slane %v3361_v25, 4 }
 0x175   : > { %v710_v42 = vsel %vm449_vm13, %v706_v39, %v707_v51 }
 0x176   : > { %v711_v62 = vsel %vm3784_vm3, %v699_v16, %v710_v42  ;;  %v2515_v46 = vld [vmem:[#allocation3 + $0x108] sm:$0xf]  ;;  %v2728_v47 = vld [vmem:[#allocation3 + $0x10c] sm:$0xf]  ;;  %vm3789_vm3 = vnez %v3761_v4 }
 0x177   : > { %716 = vst [vmem:[#allocation3 + $0x68] sm:$0xff] %v711_v62  ;;  %v2516_v50 = vor.u32 %v2730_v43, %v2515_v46  ;;  %v2520_v52 = vor.u32 %v2728_v47, %v2517_v48  ;;  %v2419_v40 = vld [vmem:[#allocation3 + $0x48] sm:$0xf]  ;;  %v2704_v18 = vld [vmem:[#allocation3 + $0x4c] sm:$0xf] }
 0x179   : > { %1337 = vmatpush.bf16.msrb.mxu3 %v2516_v50  ;;  %1365 = vmatpush.bf16.msrb.mxu0 %v2520_v52 }
 0x17a   : > { %v705_v56 = vpop.permute.xlu1 %704  ;;  %v533_v61 = vpop.permute.xlu2 %532 }
 0x17b   : > { %v709_v55 = vrot.slane %v705_v56, 4  ;;  %v538_v11 = vrot.slane %v533_v61, 4  ;;  %v535_v3 = vpop.permute.xlu0 %534 }
 0x17c   : > { %v539_v9 = vrot.slane %v535_v3, 4  ;;  %2523 = vmatmul.msk.bf16.vlgmr.msrb.gmra.mxu3 %vm512_vm8, %v3296_v36 }
 0x17d   : > { %1344 = vmatpush.bf16.msra.mxu3 %v2504_v22  ;;  %v712_v13 = vsel %vm449_vm13, %v708_v63, %v709_v55 }
 0x17e   : > { %v713_v14 = vsel %vm3785_vm9, %v3343_v5, %v712_v13  ;;  %v542_v15 = vsel %vm449_vm13, %v538_v11, %v539_v9  ;;  %v2435_v27 = vld [vmem:[#allocation3 + $0x68] sm:$0xf]  ;;  %v2708_v58 = vld [vmem:[#allocation3 + $0x6c] sm:$0xf] }
 0x17f   : > { %717 = vst [vmem:[#allocation3 + $0x78] sm:$0xff] %v713_v14  ;;  %v543_v34 = vsel %vm512_vm8, %v533_v61, %v542_v15 }
 0x180   : > { %547 = vst [vmem:[#allocation3 + $0x38] sm:$0xff] %v543_v34 }
 0x181   : > { %1345 = vmatpush.bf16.msra.mxu3 %v2488_v8 }
 0x182   : > { %v619_v1 = vpop.permute.xlu1 %618  ;;  %v474_v43 = vpop.permute.xlu2 %473 }
 0x183   : > { %v624_v24 = vrot.slane %v619_v1, 4  ;;  %v480_v45 = vrot.slane %v474_v43, 4  ;;  %v476_v56 = vpop.permute.xlu0 %475 }
 0x184   : > { %2524 = vmatmul.msk.bf16.vlgmr.msrb.gmra.mxu0 %vm512_vm8, %v3296_v36  ;;  %v481_v63 = vrot.slane %v476_v56, 4 }
 0x185   : > { %1346 = vmatpush.bf16.msra.mxu3 %v2472_v19  ;;  %v628_v5 = vsel %vm449_vm13, %v624_v24, %v625_v20 }
 0x186   : > { %v629_v28 = vsel %vm3786_vm4, %v619_v1, %v628_v5  ;;  %v2710_v49 = vld [vmem:[#allocation3 + $0x74] sm:$0xf0]  ;;  %v2437_v35 = vld [vmem:[#allocation3 + $0x78] sm:$0xf0] }
 0x187   : > { %633 = vst [vmem:[#allocation3 + $0x58] sm:$0xff] %v629_v28  ;;  %v2436_v10 = vor.u32 %v2710_v49, %v2435_v27  ;;  %v2440_v31 = vor.u32 %v2708_v58, %v2437_v35  ;;  %v2702_v47 = vld [vmem:[#allocation3 + $0x34] sm:$0xf0] }
 0x189   : > { %1347 = vmatpush.bf16.msra.mxu3 %v2456_v32  ;;  %1320 = vmatpush.bf16.msra.mxu1 %v2436_v10 }
 0x18a   : > { %v531_v17 = vpop.permute.xlu1 %530  ;;  %v3389_v60 = vpop.permute.xlu2 %1376 }
 0x18b   : > { %v537_v38 = vrot.slane %v531_v17, 4  ;;  %v3397_v58 = vpop.permute.xlu0 %1381 }
 0x18d   : > { %1348 = vmatpush.bf16.msra.mxu3 %v2440_v31  ;;  %v540_v36 = vsel %vm449_vm13, %v536_v37, %v537_v38 }
 0x18e   : > { %v541_v41 = vsel %vm512_vm8, %v3361_v25, %v540_v36  ;;  %v2706_v16 = vld [vmem:[#allocation3 + $0x54] sm:$0xf0]  ;;  %v2421_v51 = vld [vmem:[#allocation3 + $0x58] sm:$0xf0] }
 0x18f   : > { %546 = vst [vmem:[#allocation3 + $0x28] sm:$0xff] %v541_v41  ;;  %v2420_v39 = vor.u32 %v2706_v16, %v2419_v40  ;;  %v2424_v42 = vor.u32 %v2704_v18, %v2421_v51  ;;  %v2405_v25 = vld [vmem:[#allocation3 + $0x38] sm:$0xf0] }
 0x191   : > { %1321 = vmatpush.bf16.msra.mxu1 %v2420_v39  ;;  %1349 = vmatpush.bf16.msra.mxu3 %v2424_v42 }
 0x192   : > { %v472_v44 = vpop.permute.xlu1 %471  ;;  %v3400_v40 = vpop.permute.xlu2 %1401 }
 0x193   : > { %v479_v62 = vrot.slane %v472_v44, 4 }
 0x195   : > { %v483_v46 = vsel %vm449_vm13, %v479_v62, %v480_v45 }
 0x196   : > { %v484_v48 = vsel %vm3787_vm15, %v472_v44, %v483_v46  ;;  %v2403_v50 = vld [vmem:[#allocation3 + $0x28] sm:$0xf]  ;;  %v2700_v52 = vld [vmem:[#allocation3 + $0x2c] sm:$0xf] }
 0x197   : > { %489 = vst [vmem:[#allocation3 + $0x8] sm:$0xff] %v484_v48  ;;  %v2404_v22 = vor.u32 %v2702_v47, %v2403_v50  ;;  %v2408_v23 = vor.u32 %v2700_v52, %v2405_v25 }
 0x199   : > { %1322 = vmatpush.bf16.msra.mxu1 %v2404_v22  ;;  %1350 = vmatpush.bf16.msra.mxu3 %v2408_v23 }
 0x19a   : > { %v478_v61 = vpop.permute.xlu1 %477 }
 0x19b   : > { %v482_v55 = vrot.slane %v478_v61, 4 }
 0x19d   : > { %v485_v11 = vsel %vm449_vm13, %v481_v63, %v482_v55 }
 0x19e   : > { %v486_v0 = vsel %vm3788_vm5, %v476_v56, %v485_v11  ;;  %v2387_v3 = vld [vmem:[#allocation3 + $0x8] sm:$0xf]  ;;  %v2696_v9 = vld [vmem:[#allocation3 + $0xc] sm:$0xf] }
 0x19f   : > { %490 = vst [vmem:[#allocation3 + $0x18] sm:$0xff] %v486_v0 }
 0x1a2   : > { %v3392_v32 = vpop.permute.xlu1 %1396 }
 0x1a6   : > { %v2698_v8 = vld [vmem:[#allocation3 + $0x14] sm:$0xf0]  ;;  %v2389_v13 = vld [vmem:[#allocation3 + $0x18] sm:$0xf0] }
 0x1a7   : > { %v2388_v29 = vor.u32 %v2698_v8, %v2387_v3  ;;  %v2392_v14 = vor.u32 %v2696_v9, %v2389_v13 }
 0x1a9   : > { %1323 = vmatpush.bf16.msra.mxu1 %v2388_v29  ;;  %1351 = vmatpush.bf16.msra.mxu3 %v2392_v14 }
 0x1ac   : > { %1324 = vmatmul.bf16.vlgmr.msra.gmra.mxu1 %v3359_v2  ;;  %1352 = vmatmul.bf16.vlgmr.msra.gmra.mxu3 %v3359_v2 }
 0x1c7   : > { %v1283_v15 = vpop.f32.mrf.mxu2 }
 0x1c8   : > { %v1311_v1 = vpop.f32.mrf.mxu3 }
 0x1cf   : > { %v1285_v21 = vpop.f32.mrf.mxu2 }
 0x1d0   : > { %v1313_v17 = vpop.f32.mrf.mxu3 }
 0x1f1   : > { %v1269_v34 = vpop.f32.mrf.mxu0 }
 0x1f2   : > { %v1284_v19 = vadd.f32 %v1283_v15, %v1269_v34 }
 0x1f4   : > { %v1384_v20 = vmul.f32 %v3389_v60, %v1284_v19 }
 0x1f6   : > { %v1404_v27 = vadd.f32 %v3392_v32, %v1384_v20 }
 0x1f7   : > { %v1297_v24 = vpop.f32.mrf.mxu2 }
 0x1f8   : > { %v1312_v26 = vadd.f32 %v1311_v1, %v1297_v24  ;;  %v1412_v35 = vmax.f32 %v1404_v27, 0.0 }
 0x1f9   : > { %v1271_v5 = vpop.f32.mrf.mxu0 }
 0x1fa   : > { %v1385_v28 = vmul.f32 %v3389_v60, %v1312_v26  ;;  %v1286_v49 = vadd.f32 %v1285_v21, %v1271_v5 }
 0x1fc   : > { %v1405_v2 = vadd.f32 %v3392_v32, %v1385_v28  ;;  %v1388_v31 = vmul.f32 %v3397_v58, %v1286_v49  ;;  %v3456_v49 = vpop.permute.xlu2 %1762 }
 0x1fd   : > { %v1769_v30 = vrot.slane %v3456_v49, 4 }
 0x1fe   : > { %v1413_v10 = vmax.f32 %v1405_v2, 0.0  ;;  %v1408_v41 = vadd.f32 %v3400_v40, %v1388_v31 }
 0x1ff   : > { %v1299_v37 = vpop.f32.mrf.mxu2  ;;  %v1339_v56 = vpop.f32.mrf.mxu3 }
 0x200   : > { %v1420_v38 = vpack.c.bf16 %v1413_v10, %v1412_v35  ;;  %v1314_v36 = vadd.f32 %v1313_v17, %v1299_v37  ;;  %v1416_v39 = vmax.f32 %v1408_v41, 0.0 }
 0x201   : > { %v1367_v14 = vpop.f32.mrf.mxu0 }
 0x202   : > { %1424 = vst [vmem:[#allocation2 + $0x4] sm:$0xff] %v1420_v38  ;;  %v1389_v16 = vmul.f32 %v3397_v58, %v1314_v36  ;;  %1820 = vrot.lane.b32.xlu0 %v1420_v38, %s2804_s23  ;;  %v1752_v18 = vsel %vm2901_vm0, %v1420_v38, 0  ;;  %v1688_v48 = vsel %vm3046_vm10, %v1420_v38, 0  ;;  %v1872_v25 = vsel %vm2990_vm12, %v1420_v38, 0 }
 0x203   : > { %1760 = vrot.lane.b32.xlu1 %v1752_v18, %s2802_s21  ;;  %1678 = vst [vmem:[#allocation3 + $0x80] sm:$0xff] %v1420_v38 }
 0x204   : > { %v1409_v51 = vadd.f32 %v3400_v40, %v1389_v16 }
 0x206   : > { %v1417_v42 = vmax.f32 %v1409_v51, 0.0 }
 0x207   : > { %v1341_v0 = vpop.f32.mrf.mxu3 }
 0x208   : > { %v1422_v43 = vpack.c.bf16 %v1417_v42, %v1416_v39  ;;  %v3476_v42 = vpop.permute.xlu2 %1702 }
 0x209   : > { %v1492_v44 = vld [vmem:[#allocation2] sm:$0xff]  ;;  %v1493_v45 = vld [vmem:[#allocation2 + $0x8] sm:$0xf]  ;;  %v1369_v35 = vpop.f32.mrf.mxu0 }
 0x20a   : > { %v1613_v62 = vld [vmem:[#allocation2 + $0x8] sm:$0xf]  ;;  %1425 = vst [vmem:[#allocation2 + $0x14] sm:$0xff] %v1422_v43  ;;  %1500 = vrot.lane.b32.xlu2 %v1492_v44, %s2805_s30  ;;  %1502 = vrot.lane.b32.xlu0 %v1493_v45, %s2805_s30  ;;  %v1616_v50 = vsel %vm3000_vm14, %v1492_v44, 0  ;;  %v1552_v22 = vsel %vm2962_vm11, %v1492_v44, 0  ;;  %v1432_v23 = vsel %vm3021_vm1, %v1492_v44, 0 }
 0x20b   : > { %v1617_v46 = vsel %vm3006_vm2, %v1613_v62, 0  ;;  %1679 = vst [vmem:[#allocation3 + $0x90] sm:$0xff] %v1422_v43  ;;  %v1549_v47 = vld [vmem:[#allocation2 + $0x8] sm:$0xf]  ;;  %v1754_v55 = vsel %vm2901_vm0, %v1422_v43, 0  ;;  %v1690_v29 = vsel %vm3046_vm10, %v1422_v43, 0 }
 0x20c   : > { %1626 = vrot.lane.b32.xlu1 %v1617_v46, %s2799_s18  ;;  %v1553_v52 = vsel %vm2948_vm7, %v1549_v47, 0  ;;  %v1429_v61 = vld [vmem:[#allocation2 + $0x8] sm:$0xf]  ;;  %v1874_v28 = vsel %vm2990_vm12, %v1422_v43, 0 }
 0x20d   : > { %v1433_v63 = vsel %vm3789_vm3, %v1429_v61, 0 }
 0x210   : > { %v3493_v47 = vpop.permute.xlu2 %1850 }
 0x211   : > { %v1494_v11 = vld [vmem:[#allocation2 + $0x10] sm:$0xff]  ;;  %v1615_v3 = vld [vmem:[#allocation2 + $0x18] sm:$0xf] }
 0x212   : > { %1696 = vrot.lane.b32.xlu2 %v1688_v48, %s2801_s20  ;;  %1624 = vrot.lane.b32.xlu0 %v1616_v50, %s2799_s18  ;;  %v1619_v9 = vsel %vm3006_vm2, %v1615_v3, 0  ;;  %v1551_v21 = vld [vmem:[#allocation2 + $0x18] sm:$0xf]  ;;  %v1618_v41 = vsel %vm3000_vm14, %v1494_v11, 0  ;;  %v1434_v16 = vsel %vm3021_vm1, %v1494_v11, 0 }
 0x213   : > { %v1495_v20 = vld [vmem:[#allocation2 + $0x18] sm:$0xf]  ;;  %v1555_v24 = vsel %vm2948_vm7, %v1551_v21, 0 }
 0x214   : > { %1562 = vrot.lane.b32.xlu1 %v1553_v52, %s2798_s17  ;;  %v1431_v37 = vld [vmem:[#allocation2 + $0x18] sm:$0xf] }
 0x215   : > { %v1435_v51 = vsel %vm3789_vm3, %v1431_v37, 0 }
 0x218   : > { %v3508_v61 = vpop.permute.xlu2 %1886 }
 0x21a   : > { %1880 = vrot.lane.b32.xlu2 %v1872_v25, %s2803_s22  ;;  %1560 = vrot.lane.b32.xlu0 %v1552_v22, %s2798_s17  ;;  %v3500_v25 = vpop.permute.xlu0 %1826 }
 0x21c   : > { %1440 = vrot.lane.b32.xlu1 %v1432_v23, %s2800_s19 }
 0x222   : > { %1442 = vrot.lane.b32.xlu2 %v1433_v63, %s2800_s19  ;;  %1764 = vrot.lane.b32.xlu0 %v1754_v55, %s2802_s21 }
 0x224   : > { %1504 = vrot.lane.b32.xlu1 %v1494_v11, %s2805_s30 }
 0x229   : > { %v1325_v8 = vpop.f32.mrf.mxu1 }
 0x22a   : > { %v1340_v13 = vadd.f32 %v1339_v56, %v1325_v8  ;;  %1824 = vrot.lane.b32.xlu2 %v1422_v43, %s2804_s23  ;;  %1630 = vrot.lane.b32.xlu0 %v1619_v9, %s2799_s18 }
 0x22c   : > { %1700 = vrot.lane.b32.xlu1 %v1690_v29, %s2801_s20  ;;  %v1386_v15 = vmul.f32 %v3389_v60, %v1340_v13  ;;  %v3527_v29 = vpop.permute.xlu2 %1794 }
 0x22e   : > { %v1406_v26 = vadd.f32 %v3392_v32, %v1386_v15 }
 0x22f   : > { %v1353_v34 = vpop.f32.mrf.mxu3 }
 0x230   : > { %v1368_v19 = vadd.f32 %v1367_v14, %v1353_v34  ;;  %v1414_v10 = vmax.f32 %v1406_v26, 0.0 }
 0x231   : > { %v1327_v1 = vpop.f32.mrf.mxu1 }
 0x232   : > { %v1387_v5 = vmul.f32 %v3389_v60, %v1368_v19  ;;  %v1342_v27 = vadd.f32 %v1341_v0, %v1327_v1  ;;  %1506 = vrot.lane.b32.xlu2 %v1495_v20, %s2805_s30  ;;  %1566 = vrot.lane.b32.xlu0 %v1555_v24, %s2798_s17  ;;  %v1699_v0 = vpop.permute.xlu0 %1698 }
 0x234   : > { %1884 = vrot.lane.b32.xlu1 %v1874_v28, %s2803_s22  ;;  %v1407_v2 = vadd.f32 %v3392_v32, %v1387_v5  ;;  %v1390_v17 = vmul.f32 %v3397_v58, %v1342_v27  ;;  %v1705_v27 = vrot.slane %v1699_v0, 4 }
 0x236   : > { %v1415_v31 = vmax.f32 %v1407_v2, 0.0  ;;  %v1410_v32 = vadd.f32 %v3400_v40, %v1390_v17 }
 0x237   : > { %v1355_v60 = vpop.f32.mrf.mxu3 }
 0x238   : > { %v3460_v38 = vpack.c.bf16 %v1415_v31, %v1414_v10  ;;  %v1370_v36 = vadd.f32 %v1369_v35, %v1355_v60  ;;  %v1418_v43 = vmax.f32 %v1410_v32, 0.0 }
 0x23a   : > { %1426 = vst [vmem:[#allocation2 + $0x24] sm:$0xff] %v3460_v38  ;;  %v1391_v18 = vmul.f32 %v3397_v58, %v1370_v36  ;;  %1628 = vrot.lane.b32.xlu2 %v1618_v41, %s2799_s18  ;;  %1444 = vrot.lane.b32.xlu0 %v1434_v16, %s2800_s19  ;;  %v1554_v58 = vsel %vm2962_vm11, %v1494_v11, 0  ;;  %v1720_v62 = vsel %vm3046_vm10, %v3460_v38, 0  ;;  %v1784_v63 = vsel %vm2901_vm0, %v3460_v38, 0  ;;  %v1883_v15 = vpop.permute.xlu0 %1882 }
 0x23b   : > { %1682 = vst [vmem:[#allocation3 + $0x88] sm:$0xff] %v3460_v38  ;;  %v1889_v36 = vrot.slane %v1883_v15, 4  ;;  %v1904_v49 = vsel %vm2990_vm12, %v3460_v38, 0 }
 0x23c   : > { %1446 = vrot.lane.b32.xlu1 %v1435_v51, %s2800_s19  ;;  %v1411_v39 = vadd.f32 %v3400_v40, %v1391_v18  ;;  %v3491_v40 = vpop.permute.xlu1 %1822 }
 0x23d   : > { %v1829_v37 = vrot.slane %v3491_v40, 4 }
 0x23e   : > { %v1419_v44 = vmax.f32 %v1411_v39, 0.0 }
 0x240   : > { %v3478_v45 = vpack.c.bf16 %v1419_v44, %v1418_v43 }
 0x241   : > { %v1645_v46 = vld [vmem:[#allocation2 + $0x28] sm:$0xf]  ;;  %v1644_v52 = vld [vmem:[#allocation2 + $0x20] sm:$0xff] }
 0x242   : > { %1427 = vst [vmem:[#allocation2 + $0x34] sm:$0xff] %v3478_v45  ;;  %1564 = vrot.lane.b32.xlu2 %v1554_v58, %s2798_s17  ;;  %1728 = vrot.lane.b32.xlu0 %v1720_v62, %s2801_s20  ;;  %v1521_v48 = vld [vmem:[#allocation2 + $0x28] sm:$0xf]  ;;  %v1649_v50 = vsel %vm3006_vm2, %v1645_v46, 0  ;;  %v1648_v23 = vsel %vm3000_vm14, %v1644_v52, 0  ;;  %v1584_v56 = vsel %vm2962_vm11, %v1644_v52, 0  ;;  %v3545_v26 = vpop.permute.xlu0 %1734 }
 0x243   : > { %1683 = vst [vmem:[#allocation3 + $0x98] sm:$0xff] %v3478_v45  ;;  %v1461_v55 = vld [vmem:[#allocation2 + $0x28] sm:$0xf]  ;;  %v1464_v8 = vsel %vm3021_vm1, %v1644_v52, 0  ;;  %v1722_v14 = vsel %vm3046_vm10, %v3478_v45, 0  ;;  %vm3790_vm10 = vcmask 1039360  }
 0x244   : > { %1848 = vrot.lane.b32.xlu1 %v3460_v38, %s2804_s23  ;;  %v3502_v22 = vpop.permute.xlu1 %1766  ;;  %v1581_v11 = vld [vmem:[#allocation2 + $0x28] sm:$0xf]  ;;  %v1465_v9 = vsel %vm3789_vm3, %v1461_v55, 0  ;;  %v1786_v57 = vsel %vm2901_vm0, %v3478_v45, 0  ;;  %vm3791_vm0 = vcmask 908288   ;;  %v1905_v46 = vsel %vm2984_vm6, %v1901_v7, 0 }
 0x245   : > { %v1585_v13 = vsel %vm2948_vm7, %v1581_v11, 0  ;;  %v1906_v55 = vsel %vm2990_vm12, %v3478_v45, 0 }
 0x249   : > { %v1523_v21 = vld [vmem:[#allocation2 + $0x38] sm:$0xf]  ;;  %v1582_v20 = vld [vmem:[#allocation2 + $0x30] sm:$0xff] }
 0x24a   : > { %1530 = vrot.lane.b32.xlu2 %v1521_v48, %s2805_s30  ;;  %1658 = vrot.lane.b32.xlu0 %v1649_v50, %s2799_s18  ;;  %v1647_v1 = vld [vmem:[#allocation2 + $0x38] sm:$0xf]  ;;  %v1650_v33 = vsel %vm3000_vm14, %v1582_v20, 0  ;;  %v1586_v10 = vsel %vm2962_vm11, %v1582_v20, 0  ;;  %v1466_v31 = vsel %vm3021_vm1, %v1582_v20, 0  ;;  %vm3792_vm11 = vcmask 916480   ;;  %vm3796_vm1 = vmmov %vm3786_vm4 }
 0x24b   : > { %v1651_v24 = vsel %vm3006_vm2, %v1647_v1, 0  ;;  %v1463_v32 = vld [vmem:[#allocation2 + $0x38] sm:$0xf]  ;;  %vm3793_vm14 = vcmask 924672   ;;  %vm3794_vm12 = vmmov %vm3792_vm11 }
 0x24c   : > { %1528 = vrot.lane.b32.xlu1 %v1644_v52, %s2805_s30  ;;  %v3516_v3 = vpop.permute.xlu1 %1854  ;;  %v1467_v62 = vsel %vm3789_vm3, %v1463_v32, 0  ;;  %vm3798_vm2 = vmmov %vm3793_vm14 }
 0x24d   : > { %vm3800_vm4 = vmmov %vm3790_vm10 }
 0x24e   : > { %vm3801_vm15 = vmmov %vm3796_vm1 }
 0x252   : > { %1656 = vrot.lane.b32.xlu2 %v1648_v23, %s2799_s18  ;;  %1592 = vrot.lane.b32.xlu0 %v1584_v56, %s2798_s17  ;;  %v1583_v56 = vld [vmem:[#allocation2 + $0x38] sm:$0xf] }
 0x253   : > { %v1587_v11 = vsel %vm2948_vm7, %v1583_v56, 0  ;;  %vm3795_vm7 = vmmov %vm3785_vm9 }
 0x254   : > { %1792 = vrot.lane.b32.xlu1 %v1784_v63, %s2802_s21  ;;  %v3535_v34 = vpop.permute.xlu1 %1798  ;;  %vm3799_vm9 = vmmov %vm3795_vm7 }
 0x25a   : > { %1472 = vrot.lane.b32.xlu2 %v1464_v8, %s2800_s19  ;;  %1474 = vrot.lane.b32.xlu0 %v1465_v9, %s2800_s19  ;;  %v1831_v9 = vrot.slane %v3500_v25, 4 }
 0x25c   : > { %1594 = vrot.lane.b32.xlu1 %v1585_v13, %s2798_s17  ;;  %v3547_v28 = vpop.permute.xlu1 %1730 }
 0x262   : > { %1732 = vrot.lane.b32.xlu2 %v1722_v14, %s2801_s20  ;;  %1852 = vrot.lane.b32.xlu0 %v3478_v45, %s2804_s23 }
 0x264   : > { %1534 = vrot.lane.b32.xlu1 %v1523_v21, %s2805_s30  ;;  %v1501_v19 = vpop.permute.xlu2 %1500 }
 0x265   : > { %v1508_v50 = vrot.slane %v1501_v19, 4 }
 0x26a   : > { %1662 = vrot.lane.b32.xlu2 %v1651_v24, %s2799_s18  ;;  %1532 = vrot.lane.b32.xlu0 %v1582_v20, %s2805_s30 }
 0x26c   : > { %1660 = vrot.lane.b32.xlu1 %v1650_v33, %s2799_s18  ;;  %v1697_v5 = vpop.permute.xlu2 %1696 }
 0x26d   : > { %v1704_v2 = vrot.slane %v1697_v5, 4 }
 0x26f   : > { %v1708_v35 = vsel %vm449_vm13, %v1704_v2, %v1705_v27 }
 0x270   : > { %v1709_v59 = vsel %vm3790_vm10, %v1697_v5, %v1708_v35  ;;  %vm3804_vm10 = vmmov %vm3800_vm4 }
 0x271   : > { %1714 = vst [vmem:[#allocation3 + $0xa0] sm:$0xff] %v1709_v59 }
 0x272   : > { %1596 = vrot.lane.b32.xlu2 %v1586_v10, %s2798_s17  ;;  %1796 = vrot.lane.b32.xlu0 %v1786_v57, %s2802_s21 }
 0x274   : > { %1476 = vrot.lane.b32.xlu1 %v1466_v31, %s2800_s19  ;;  %v1881_v17 = vpop.permute.xlu2 %1880  ;;  %v1821_v60 = vpop.permute.xlu0 %1820 }
 0x275   : > { %v1888_v12 = vrot.slane %v1881_v17, 4  ;;  %v1828_v41 = vrot.slane %v1821_v60, 4  ;;  %v1761_v16 = vpop.permute.xlu1 %1760 }
 0x276   : > { %v1768_v18 = vrot.slane %v1761_v16, 4 }
 0x277   : > { %v1892_v51 = vsel %vm449_vm13, %v1888_v12, %v1889_v36  ;;  %v1832_v39 = vsel %vm449_vm13, %v1828_v41, %v1829_v37 }
 0x278   : > { %v1893_v43 = vsel %vm3791_vm0, %v1881_v17, %v1892_v51  ;;  %v1833_v44 = vsel %vm3792_vm11, %v1821_v60, %v1832_v39  ;;  %v1772_v58 = vsel %vm449_vm13, %v1768_v18, %v1769_v30  ;;  %v1771_v30 = vrot.slane %v3502_v22, 4 }
 0x279   : > { %1898 = vst [vmem:[#allocation3 + $0x100] sm:$0xff] %v1893_v43  ;;  %v1773_v40 = vsel %vm3793_vm14, %v1761_v16, %v1772_v58  ;;  %v1707_v22 = vrot.slane %v3476_v42, 4  ;;  %vm3807_vm14 = vmmov %vm3795_vm7 }
 0x27a   : > { %1478 = vrot.lane.b32.xlu2 %v1467_v62, %s2800_s19  ;;  %1838 = vst [vmem:[#allocation3 + $0xe0] sm:$0xff] %v1833_v44  ;;  %1912 = vrot.lane.b32.xlu0 %v1904_v49, %s2803_s22 }
 0x27b   : > { %1778 = vst [vmem:[#allocation3 + $0xc0] sm:$0xff] %v1773_v40 }
 0x27c   : > { %1914 = vrot.lane.b32.xlu1 %v1905_v46, %s2803_s22  ;;  %v1443_v48 = vpop.permute.xlu2 %1442  ;;  %v1503_v4 = vpop.permute.xlu0 %1502 }
 0x27d   : > { %v1509_v52 = vrot.slane %v1503_v4, 4  ;;  %v1449_v2 = vrot.slane %v1443_v48, 4 }
 0x27e   : > { %v1627_v23 = vpop.permute.xlu1 %1626 }
 0x27f   : > { %v1512_v63 = vsel %vm449_vm13, %v1508_v50, %v1509_v52  ;;  %v1633_v14 = vrot.slane %v1627_v23, 4 }
 0x280   : > { %v1513_v38 = vsel %vm512_vm8, %v1501_v19, %v1512_v63  ;;  %v1903_v19 = vld [vmem:[#allocation2 + $0x3c] sm:$0xf] }
 0x281   : > { %1518 = vst [vmem:[#allocation3 + $0x20] sm:$0xff] %v1513_v38  ;;  %v1907_v20 = vsel %vm2984_vm6, %v1903_v19, 0  ;;  %v2647_v59 = vld [vmem:[#allocation3 + $0xe0] sm:$0xf]  ;;  %v2761_v31 = vld [vmem:[#allocation3 + $0xe4] sm:$0xf]  ;;  %vm3797_vm6 = vmmov %vm3788_vm5 }
 0x282   : > { %1916 = vrot.lane.b32.xlu2 %v1906_v55, %s2803_s22  ;;  %1598 = vrot.lane.b32.xlu0 %v1587_v11, %s2798_s17  ;;  %v2631_v52 = vld [vmem:[#allocation3 + $0xc0] sm:$0xf]  ;;  %v2757_v38 = vld [vmem:[#allocation3 + $0xc4] sm:$0xf]  ;;  %vm3802_vm5 = vmmov %vm3791_vm0 }
 0x283   : > { %vm3803_vm3 = vmmov %vm3797_vm6 }
 0x284   : > { %v1825_v0 = vpop.permute.xlu2 %1824  ;;  %v1625_v8 = vpop.permute.xlu0 %1624  ;;  %vm3805_vm0 = vmmov %vm3792_vm11 }
 0x285   : > { %v1830_v13 = vrot.slane %v1825_v0, 4  ;;  %v1632_v15 = vrot.slane %v1625_v8, 4  ;;  %vm3806_vm11 = vmmov %vm3800_vm4 }
 0x286   : > { %v1563_v21 = vpop.permute.xlu1 %1562 }
 0x287   : > { %v1834_v54 = vsel %vm449_vm13, %v1830_v13, %v1831_v9  ;;  %v1636_v45 = vsel %vm449_vm13, %v1632_v15, %v1633_v14  ;;  %v1569_v33 = vrot.slane %v1563_v21, 4  ;;  %v1891_v21 = vrot.slane %v3508_v61, 4 }
 0x288   : > { %v1835_v6 = vsel %vm3794_vm12, %v1825_v0, %v1834_v54  ;;  %v1637_v1 = vsel %vm3795_vm7, %v1625_v8, %v1636_v45  ;;  %vm3808_vm12 = vmmov %vm3798_vm2 }
 0x289   : > { %1839 = vst [vmem:[#allocation3 + $0xf0] sm:$0xff] %v1835_v6  ;;  %vm3809_vm7 = vmmov %vm3803_vm3 }
 0x28a   : > { %1642 = vst [vmem:[#allocation3 + $0x60] sm:$0xff] %v1637_v1  ;;  %1918 = vrot.lane.b32.xlu0 %v1907_v20, %s2803_s22  ;;  %v2615_v1 = vld [vmem:[#allocation3 + $0xa0] sm:$0xf]  ;;  %v2753_v20 = vld [vmem:[#allocation3 + $0xa4] sm:$0xf] }
 0x28c   : > { %v1507_v25 = vpop.permute.xlu2 %1506  ;;  %v1561_v24 = vpop.permute.xlu0 %1560 }
 0x28d   : > { %v1568_v5 = vrot.slane %v1561_v24, 4  ;;  %v1511_v51 = vrot.slane %v1507_v25, 4 }
 0x28e   : > { %v1441_v27 = vpop.permute.xlu1 %1440 }
 0x28f   : > { %v1448_v35 = vrot.slane %v1441_v27, 4  ;;  %v1572_v10 = vsel %vm449_vm13, %v1568_v5, %v1569_v33 }
 0x290   : > { %v2763_v57 = vld [vmem:[#allocation3 + $0xec] sm:$0xf0]  ;;  %v2649_v17 = vld [vmem:[#allocation3 + $0xf0] sm:$0xf0]  ;;  %v1573_v60 = vsel %vm3796_vm1, %v1561_v24, %v1572_v10 }
 0x291   : > { %v1452_v53 = vsel %vm449_vm13, %v1448_v35, %v1449_v2  ;;  %v2648_v37 = vor.u32 %v2763_v57, %v2647_v59  ;;  %v2652_v36 = vor.u32 %v2761_v31, %v2649_v17  ;;  %1578 = vst [vmem:[#allocation3 + $0x40] sm:$0xff] %v1573_v60  ;;  %v2751_v2 = vld [vmem:[#allocation3 + $0x8c] sm:$0xf0]  ;;  %v2601_v35 = vld [vmem:[#allocation3 + $0x90] sm:$0xf0] }
 0x292   : > { %v1453_v12 = vsel %vm3797_vm6, %v1441_v27, %v1452_v53  ;;  %v2599_v31 = vld [vmem:[#allocation3 + $0x80] sm:$0xf]  ;;  %v2749_v17 = vld [vmem:[#allocation3 + $0x84] sm:$0xf]  ;;  %vm3810_vm6 = vmmov %vm3805_vm0 }
 0x293   : > { %1458 = vst [vmem:[#allocation3] sm:$0xff] %v1453_v12  ;;  %2162 = vmatpush.bf16.msra.mxu2 %v2648_v37  ;;  %2190 = vmatpush.bf16.msra.mxu0 %v2652_v36  ;;  %v2600_v53 = vor.u32 %v2751_v2, %v2599_v31  ;;  %v2604_v37 = vor.u32 %v2749_v17, %v2601_v35 }
 0x294   : > { %v1629_v41 = vpop.permute.xlu2 %1628  ;;  %v1765_v16 = vpop.permute.xlu0 %1764 }
 0x295   : > { %v1770_v32 = vrot.slane %v1765_v16, 4  ;;  %v1634_v49 = vrot.slane %v1629_v41, 4 }
 0x296   : > { %v1505_v18 = vpop.permute.xlu1 %1504 }
 0x297   : > { %v1510_v39 = vrot.slane %v1505_v18, 4  ;;  %v1774_v7 = vsel %vm449_vm13, %v1770_v32, %v1771_v30  ;;  %v2765_v30 = vld [vmem:[#allocation3 + $0x104] sm:$0xf] }
 0x298   : > { %v1775_v43 = vsel %vm3798_vm2, %v1765_v16, %v1774_v7  ;;  %vm3811_vm2 = vmmov %vm3799_vm9 }
 0x299   : > { %v1514_v44 = vsel %vm449_vm13, %v1510_v39, %v1511_v51  ;;  %1779 = vst [vmem:[#allocation3 + $0xd0] sm:$0xff] %v1775_v43 }
 0x29a   : > { %v1515_v58 = vsel %vm512_vm8, %v1505_v18, %v1514_v44  ;;  %v2583_v18 = vld [vmem:[#allocation3 + $0x60] sm:$0xf]  ;;  %v2745_v44 = vld [vmem:[#allocation3 + $0x64] sm:$0xf] }
 0x29b   : > { %1519 = vst [vmem:[#allocation3 + $0x30] sm:$0xff] %v1515_v58 }
 0x29c   : > { %v1565_v62 = vpop.permute.xlu2 %1564  ;;  %v1631_v40 = vpop.permute.xlu0 %1630 }
 0x29d   : > { %v1635_v46 = vrot.slane %v1631_v40, 4  ;;  %v1570_v13 = vrot.slane %v1565_v62, 4 }
 0x29e   : > { %v1701_v48 = vpop.permute.xlu1 %1700 }
 0x29f   : > { %v1706_v4 = vrot.slane %v1701_v48, 4  ;;  %v1638_v50 = vsel %vm449_vm13, %v1634_v49, %v1635_v46 }
 0x2a0   : > { %v1639_v23 = vsel %vm3799_vm9, %v1629_v41, %v1638_v50  ;;  %v2759_v63 = vld [vmem:[#allocation3 + $0xcc] sm:$0xf0]  ;;  %v2633_v55 = vld [vmem:[#allocation3 + $0xd0] sm:$0xf0]  ;;  %v2663_v41 = vld [vmem:[#allocation3 + $0x100] sm:$0xf] }
 0x2a1   : > { %v1710_v56 = vsel %vm449_vm13, %v1706_v4, %v1707_v22  ;;  %1643 = vst [vmem:[#allocation3 + $0x70] sm:$0xff] %v1639_v23  ;;  %v2632_v0 = vor.u32 %v2759_v63, %v2631_v52  ;;  %v2636_v8 = vor.u32 %v2757_v38, %v2633_v55  ;;  %v1737_v22 = vrot.slane %v3547_v28, 4  ;;  %v2567_v52 = vld [vmem:[#allocation3 + $0x40] sm:$0xf]  ;;  %v2741_v38 = vld [vmem:[#allocation3 + $0x44] sm:$0xf]  ;;  %vm3812_vm9 = vmmov %vm3808_vm12 }
 0x2a2   : > { %v1711_v11 = vsel %vm3800_vm4, %v1701_v48, %v1710_v56  ;;  %v1857_v23 = vrot.slane %v3493_v47, 4  ;;  %v2553_v28 = vld [vmem:[#allocation3 + $0x30] sm:$0xf0]  ;;  %vm3813_vm4 = vmmov %vm3803_vm3 }
 0x2a3   : > { %1715 = vst [vmem:[#allocation3 + $0xb0] sm:$0xff] %v1711_v11  ;;  %2163 = vmatpush.bf16.msra.mxu2 %v2632_v0  ;;  %2191 = vmatpush.bf16.msra.mxu0 %v2636_v8  ;;  %v2739_v0 = vld [vmem:[#allocation3 + $0x2c] sm:$0xf0] }
 0x2a4   : > { %v3610_v42 = vpop.permute.xlu2 %1530  ;;  %v1567_v9 = vpop.permute.xlu0 %1566 }
 0x2a5   : > { %v1571_v14 = vrot.slane %v1567_v9, 4 }
 0x2a6   : > { %v1885_v15 = vpop.permute.xlu1 %1884 }
 0x2a7   : > { %v1890_v19 = vrot.slane %v1885_v15, 4  ;;  %v1574_v54 = vsel %vm449_vm13, %v1570_v13, %v1571_v14  ;;  %v2551_v14 = vld [vmem:[#allocation3 + $0x20] sm:$0xf] }
 0x2a8   : > { %v1575_v45 = vsel %vm3801_vm15, %v1565_v62, %v1574_v54  ;;  %v2747_v36 = vld [vmem:[#allocation3 + $0x6c] sm:$0xf0]  ;;  %v2585_v16 = vld [vmem:[#allocation3 + $0x70] sm:$0xf0]  ;;  %v2552_v47 = vor.u32 %v2739_v0, %v2551_v14  ;;  %vm3814_vm15 = vmmov %vm3802_vm5 }
 0x2a9   : > { %v1894_v6 = vsel %vm449_vm13, %v1890_v19, %v1891_v21  ;;  %1579 = vst [vmem:[#allocation3 + $0x50] sm:$0xff] %v1575_v45  ;;  %v2584_v7 = vor.u32 %v2747_v36, %v2583_v18  ;;  %v2588_v62 = vor.u32 %v2745_v44, %v2585_v16 }
 0x2aa   : > { %v1895_v25 = vsel %vm3802_vm5, %v1885_v15, %v1894_v6  ;;  %v2755_v24 = vld [vmem:[#allocation3 + $0xac] sm:$0xf0]  ;;  %v2617_v33 = vld [vmem:[#allocation3 + $0xb0] sm:$0xf0]  ;;  %v2737_v15 = vld [vmem:[#allocation3 + $0x24] sm:$0xf] }
 0x2ab   : > { %1899 = vst [vmem:[#allocation3 + $0x110] sm:$0xff] %v1895_v25  ;;  %v2616_v5 = vor.u32 %v2755_v24, %v2615_v1  ;;  %v2620_v27 = vor.u32 %v2753_v20, %v2617_v33  ;;  %v2556_v21 = vor.u32 %v2737_v15, %v2553_v28  ;;  %v1739_v1 = vrot.slane %v3545_v26, 4  ;;  %vm3815_vm5 = vmmov %vm3796_vm1 }
 0x2ac   : > { %v3617_v61 = vpop.permute.xlu2 %1656  ;;  %v1445_v59 = vpop.permute.xlu0 %1444 }
 0x2ad   : > { %2164 = vmatpush.bf16.msra.mxu2 %v2616_v5  ;;  %2192 = vmatpush.bf16.msra.mxu0 %v2620_v27  ;;  %v1450_v10 = vrot.slane %v1445_v59, 4  ;;  %v1664_v20 = vrot.slane %v3617_v61, 4  ;;  %v2535_v5 = vld [vmem:[#allocation3] sm:$0xf]  ;;  %v1537_v27 = vrot.slane %v3610_v42, 4 }
 0x2ae   : > { %v1447_v57 = vpop.permute.xlu1 %1446  ;;  %v2731_v42 = vld [vmem:[%s3731_s7 + $0x4] sm:$0xf] }
 0x2af   : > { %v1451_v60 = vrot.slane %v1447_v57, 4 }
 0x2b0   : > { %v2743_v40 = vld [vmem:[#allocation3 + $0x4c] sm:$0xf0]  ;;  %v2569_v48 = vld [vmem:[#allocation3 + $0x50] sm:$0xf0] }
 0x2b1   : > { %v1454_v12 = vsel %vm449_vm13, %v1450_v10, %v1451_v60  ;;  %2165 = vmatpush.bf16.msra.mxu2 %v2600_v53  ;;  %2193 = vmatpush.bf16.msra.mxu0 %v2604_v37  ;;  %v2568_v63 = vor.u32 %v2743_v40, %v2567_v52  ;;  %v2572_v11 = vor.u32 %v2741_v38, %v2569_v48  ;;  %v2529_v37 = vld [vmem:[%s3731_s7 + $0x8] sm:$0xf0]  ;;  %v2527_v48 = vld [vmem:[%s3731_s7] sm:$0xf]  ;;  %v1859_v52 = vrot.slane %v3516_v3, 4 }
 0x2b2   : > { %v1455_v32 = vsel %vm3803_vm3, %v1445_v59, %v1454_v12  ;;  %v2767_v51 = vld [vmem:[#allocation3 + $0x10c] sm:$0xf0]  ;;  %v2665_v39 = vld [vmem:[#allocation3 + $0x110] sm:$0xf0]  ;;  %v2733_v59 = vld [vmem:[#allocation3 + $0x4] sm:$0xf]  ;;  %v3645_v36 = vor.u32 %v2731_v42, %v2529_v37 }
 0x2b3   : > { %1459 = vst [vmem:[#allocation3 + $0x10] sm:$0xff] %v1455_v32  ;;  %v2664_v43 = vor.u32 %v2767_v51, %v2663_v41  ;;  %v2668_v58 = vor.u32 %v2765_v30, %v2665_v39  ;;  %v1801_v41 = vrot.slane %v3527_v29, 4  ;;  %vm3816_vm3 = vmmov %vm3814_vm15 }
 0x2b4   : > { %v3621_v49 = vpop.permute.xlu2 %1472  ;;  %v1729_v46 = vpop.permute.xlu0 %1728 }
 0x2b5   : > { %2166 = vmatpush.bf16.msra.mxu2 %v2584_v7  ;;  %2183 = vmatpush.bf16.msrb.mxu1 %v2664_v43  ;;  %v1736_v4 = vrot.slane %v1729_v46, 4  ;;  %v1480_v51 = vrot.slane %v3621_v49, 4 }
 0x2b6   : > { %2194 = vmatpush.bf16.msra.mxu0 %v2588_v62  ;;  %v1849_v50 = vpop.permute.xlu1 %1848 }
 0x2b7   : > { %v1856_v56 = vrot.slane %v1849_v50, 4  ;;  %v1740_v55 = vsel %vm449_vm13, %v1736_v4, %v1737_v22  ;;  %v2732_v22 = vld [vmem:[%s3731_s7 + $0x4] sm:$0xf0] }
 0x2b8   : > { %v1741_v8 = vsel %vm3804_vm10, %v1729_v46, %v1740_v55  ;;  %2677 = vmatmul.msk.bf16.vlgmr.msrb.gmra.mxu1 %vm512_vm8, %v3645_v36  ;;  %v3664_v4 = vor.u32 %v2732_v22, %v2527_v48  ;;  %v2750_v48 = vld [vmem:[#allocation3 + $0x8c] sm:$0xf] }
 0x2b9   : > { %2211 = vmatpush.bf16.msra.mxu1 %v2668_v58  ;;  %v1860_v9 = vsel %vm449_vm13, %v1856_v56, %v1857_v23  ;;  %2167 = vmatpush.bf16.msra.mxu2 %v2568_v63  ;;  %1746 = vst [vmem:[#allocation3 + $0xa8] sm:$0xff] %v1741_v8 }
 0x2ba   : > { %v1861_v13 = vsel %vm3805_vm0, %v1849_v50, %v1860_v9  ;;  %2195 = vmatpush.bf16.msra.mxu0 %v2572_v11  ;;  %v2735_v19 = vld [vmem:[#allocation3 + $0xc] sm:$0xf0]  ;;  %v2537_v6 = vld [vmem:[#allocation3 + $0x10] sm:$0xf0] }
 0x2bb   : > { %1866 = vst [vmem:[#allocation3 + $0xe8] sm:$0xff] %v1861_v13  ;;  %v2536_v35 = vor.u32 %v2735_v19, %v2535_v5  ;;  %v2540_v31 = vor.u32 %v2733_v59, %v2537_v6 }
 0x2bc   : > { %v1733_v54 = vpop.permute.xlu2 %1732  ;;  %v1659_v45 = vpop.permute.xlu0 %1658 }
 0x2bd   : > { %2168 = vmatpush.bf16.msra.mxu2 %v2552_v47  ;;  %v1738_v25 = vrot.slane %v1733_v54, 4  ;;  %v1665_v24 = vrot.slane %v1659_v45, 4 }
 0x2be   : > { %2196 = vmatpush.bf16.msra.mxu0 %v2556_v21  ;;  %v1529_v33 = vpop.permute.xlu1 %1528 }
 0x2bf   : > { %v1536_v2 = vrot.slane %v1529_v33, 4  ;;  %v1742_v10 = vsel %vm449_vm13, %v1738_v25, %v1739_v1  ;;  %v1668_v57 = vsel %vm449_vm13, %v1664_v20, %v1665_v24  ;;  %v1803_v25 = vrot.slane %v3535_v34, 4 }
 0x2c0   : > { %v1743_v17 = vsel %vm3806_vm11, %v1733_v54, %v1742_v10  ;;  %v1669_v26 = vsel %vm3807_vm14, %v3617_v61, %v1668_v57 }
 0x2c1   : > { %v1540_v60 = vsel %vm449_vm13, %v1536_v2, %v1537_v27  ;;  %2169 = vmatpush.bf16.msra.mxu2 %v2536_v35  ;;  %1747 = vst [vmem:[#allocation3 + $0xb8] sm:$0xff] %v1743_v17 }
 0x2c2   : > { %v1541_v53 = vsel %vm512_vm8, %v1529_v33, %v1540_v60  ;;  %2197 = vmatpush.bf16.msra.mxu0 %v2540_v31  ;;  %1674 = vst [vmem:[#allocation3 + $0x68] sm:$0xff] %v1669_v26  ;;  %v2655_v13 = vld [vmem:[#allocation3 + $0xe8] sm:$0xf]  ;;  %v2762_v21 = vld [vmem:[#allocation3 + $0xec] sm:$0xf] }
 0x2c3   : > { %1546 = vst [vmem:[#allocation3 + $0x28] sm:$0xff] %v1541_v53 }
 0x2c4   : > { %v1593_v61 = vpop.permute.xlu0 %1592  ;;  %v1663_v58 = vpop.permute.xlu2 %1662  ;;  %2170 = vmatmul.bf16.vlgmr.msra.gmra.mxu2 %v3664_v4 }
 0x2c5   : > { %v1600_v43 = vrot.slane %v1593_v61, 4  ;;  %2198 = vmatmul.bf16.vlgmr.msra.gmra.mxu0 %v3664_v4  ;;  %v1667_v8 = vrot.slane %v1663_v58, 4  ;;  %v2752_v58 = vld [vmem:[#allocation3 + $0x94] sm:$0xf0] }
 0x2c6   : > { %v1793_v12 = vpop.permute.xlu1 %1792 }
 0x2c7   : > { %v1800_v16 = vrot.slane %v1793_v12, 4 }
 0x2c8   : > { %2678 = vmatmul.msk.bf16.vlgmr.msra.gmra.mxu1 %vm512_vm8, %v3645_v36 }
 0x2c9   : > { %v1804_v30 = vsel %vm449_vm13, %v1800_v16, %v1801_v41  ;;  %v2756_v16 = vld [vmem:[#allocation3 + $0xb4] sm:$0xf0] }
 0x2ca   : > { %v1805_v32 = vsel %vm3808_vm12, %v1793_v12, %v1804_v30  ;;  %v2625_v30 = vld [vmem:[#allocation3 + $0xb8] sm:$0xf0] }
 0x2cb   : > { %1810 = vst [vmem:[#allocation3 + $0xc8] sm:$0xff] %v1805_v32 }
 0x2cc   : > { %v1475_v18 = vpop.permute.xlu0 %1474  ;;  %v3673_v38 = vpop.permute.xlu2 %1596 }
 0x2cd   : > { %v1481_v39 = vrot.slane %v1475_v18, 4  ;;  %v2623_v18 = vld [vmem:[#allocation3 + $0xa8] sm:$0xf] }
 0x2ce   : > { %v1595_v7 = vpop.permute.xlu1 %1594 }
 0x2cf   : > { %v1601_v44 = vrot.slane %v1595_v7, 4  ;;  %v1484_v62 = vsel %vm449_vm13, %v1480_v51, %v1481_v39  ;;  %v2754_v51 = vld [vmem:[#allocation3 + $0xac] sm:$0xf]  ;;  %v1602_v39 = vrot.slane %v3673_v38, 4 }
 0x2d0   : > { %v1485_v40 = vsel %vm3809_vm7, %v3621_v49, %v1484_v62  ;;  %v2609_v62 = vld [vmem:[#allocation3 + $0x98] sm:$0xf0] }
 0x2d1   : > { %v1604_v29 = vsel %vm449_vm13, %v1600_v43, %v1601_v44  ;;  %1490 = vst [vmem:[#allocation3 + $0x8] sm:$0xff] %v1485_v40  ;;  %v2624_v43 = vor.u32 %v2756_v16, %v2623_v18  ;;  %v2628_v44 = vor.u32 %v2754_v51, %v2625_v30 }
 0x2d2   : > { %v1605_v46 = vsel %vm3796_vm1, %v1593_v61, %v1604_v29  ;;  %v2639_v60 = vld [vmem:[#allocation3 + $0xc8] sm:$0xf]  ;;  %v2758_v42 = vld [vmem:[#allocation3 + $0xcc] sm:$0xf] }
 0x2d3   : > { %1610 = vst [vmem:[#allocation3 + $0x48] sm:$0xff] %v1605_v46  ;;  %v2607_v46 = vld [vmem:[#allocation3 + $0x88] sm:$0xf] }
 0x2d4   : > { %v1853_v50 = vpop.permute.xlu0 %1852  ;;  %v1479_v1 = vpop.permute.xlu2 %1478  ;;  %v2608_v22 = vor.u32 %v2752_v58, %v2607_v46 }
 0x2d5   : > { %v1858_v49 = vrot.slane %v1853_v50, 4  ;;  %v1483_v5 = vrot.slane %v1479_v1, 4 }
 0x2d6   : > { %v1535_v23 = vpop.permute.xlu1 %1534 }
 0x2d7   : > { %v1862_v56 = vsel %vm449_vm13, %v1858_v49, %v1859_v52  ;;  %v1539_v11 = vrot.slane %v1535_v23, 4 }
 0x2d8   : > { %v1863_v63 = vsel %vm3810_vm6, %v1853_v50, %v1862_v56  ;;  %v2612_v50 = vor.u32 %v2750_v48, %v2609_v62 }
 0x2d9   : > { %1867 = vst [vmem:[#allocation3 + $0xf8] sm:$0xff] %v1863_v63  ;;  %v2591_v63 = vld [vmem:[#allocation3 + $0x68] sm:$0xf] }
 0x2dc   : > { %v1533_v55 = vpop.permute.xlu0 %1532  ;;  %v1917_v52 = vpop.permute.xlu2 %1916 }
 0x2dd   : > { %v1538_v0 = vrot.slane %v1533_v55, 4 }
 0x2de   : > { %v1661_v3 = vpop.permute.xlu1 %1660 }
 0x2df   : > { %v1666_v9 = vrot.slane %v1661_v3, 4  ;;  %v1542_v28 = vsel %vm449_vm13, %v1538_v0, %v1539_v11  ;;  %v1922_v11 = vrot.slane %v1917_v52, 4 }
 0x2e0   : > { %v1543_v14 = vsel %vm512_vm8, %v1533_v55, %v1542_v28  ;;  %v2764_v15 = vld [vmem:[#allocation3 + $0xf4] sm:$0xf0]  ;;  %v2657_v19 = vld [vmem:[#allocation3 + $0xf8] sm:$0xf0]  ;;  %v2746_v55 = vld [vmem:[#allocation3 + $0x6c] sm:$0xf] }
 0x2e1   : > { %v1670_v47 = vsel %vm449_vm13, %v1666_v9, %v1667_v8  ;;  %1547 = vst [vmem:[#allocation3 + $0x38] sm:$0xff] %v1543_v14  ;;  %v2656_v45 = vor.u32 %v2764_v15, %v2655_v13  ;;  %v2660_v6 = vor.u32 %v2762_v21, %v2657_v19  ;;  %v2742_v14 = vld [vmem:[#allocation3 + $0x4c] sm:$0xf] }
 0x2e2   : > { %v1671_v54 = vsel %vm3811_vm2, %v1661_v3, %v1670_v47 }
 0x2e3   : > { %1675 = vst [vmem:[#allocation3 + $0x78] sm:$0xff] %v1671_v54  ;;  %2218 = vmatpush.bf16.msrb.mxu3 %v2656_v45  ;;  %2246 = vmatpush.bf16.msrb.mxu1 %v2660_v6  ;;  %v2559_v45 = vld [vmem:[#allocation3 + $0x28] sm:$0xf]  ;;  %v2738_v6 = vld [vmem:[#allocation3 + $0x2c] sm:$0xf] }
 0x2e4   : > { %v1797_v20 = vpop.permute.xlu0 %1796 }
 0x2e5   : > { %v1802_v24 = vrot.slane %v1797_v20, 4 }
 0x2e6   : > { %v1477_v33 = vpop.permute.xlu1 %1476 }
 0x2e7   : > { %v1482_v27 = vrot.slane %v1477_v33, 4  ;;  %v1806_v2 = vsel %vm449_vm13, %v1802_v24, %v1803_v25  ;;  %v2543_v24 = vld [vmem:[#allocation3 + $0x8] sm:$0xf] }
 0x2e8   : > { %v1807_v35 = vsel %vm3812_vm9, %v1797_v20, %v1806_v2  ;;  %v2740_v19 = vld [vmem:[#allocation3 + $0x34] sm:$0xf0]  ;;  %v2561_v54 = vld [vmem:[#allocation3 + $0x38] sm:$0xf0] }
 0x2e9   : > { %v1486_v59 = vsel %vm449_vm13, %v1482_v27, %v1483_v5  ;;  %1811 = vst [vmem:[#allocation3 + $0xd8] sm:$0xff] %v1807_v35  ;;  %v2560_v1 = vor.u32 %v2740_v19, %v2559_v45  ;;  %v2564_v20 = vor.u32 %v2738_v6, %v2561_v54 }
 0x2ea   : > { %v1487_v10 = vsel %vm3813_vm4, %v1477_v33, %v1486_v59  ;;  %v2748_v49 = vld [vmem:[#allocation3 + $0x74] sm:$0xf0]  ;;  %v2593_v23 = vld [vmem:[#allocation3 + $0x78] sm:$0xf0] }
 0x2eb   : > { %1491 = vst [vmem:[#allocation3 + $0x18] sm:$0xff] %v1487_v10  ;;  %v2592_v3 = vor.u32 %v2748_v49, %v2591_v63  ;;  %v2596_v8 = vor.u32 %v2746_v55, %v2593_v23  ;;  %v2684_v63 = vld [vmem:[%s2924_s29 + $0x38] sm:$0xff] }
 0x2ec   : > { %v1913_v57 = vpop.permute.xlu0 %1912 }
 0x2ed   : > { %v1920_v31 = vrot.slane %v1913_v57, 4 }
 0x2ee   : > { %v1915_v17 = vpop.permute.xlu1 %1914 }
 0x2ef   : > { %v1921_v26 = vrot.slane %v1915_v17, 4 }
 0x2f0   : > { %v2760_v53 = vld [vmem:[#allocation3 + $0xd4] sm:$0xf0]  ;;  %v2641_v37 = vld [vmem:[#allocation3 + $0xd8] sm:$0xf0] }
 0x2f1   : > { %v1924_v34 = vsel %vm449_vm13, %v1920_v31, %v1921_v26  ;;  %v2640_v12 = vor.u32 %v2760_v53, %v2639_v60  ;;  %v2644_v41 = vor.u32 %v2758_v42, %v2641_v37  ;;  %v2275_v42 = vld [vmem:[%s2924_s29 + $0x8] sm:$0xff] }
 0x2f2   : > { %v1925_v61 = vsel %vm3814_vm15, %v1913_v57, %v1924_v34  ;;  %v2736_v25 = vld [vmem:[#allocation3 + $0x14] sm:$0xf0]  ;;  %v2545_v5 = vld [vmem:[#allocation3 + $0x18] sm:$0xf0]  ;;  %v2734_v57 = vld [vmem:[#allocation3 + $0xc] sm:$0xf] }
 0x2f3   : > { %1930 = vst [vmem:[#allocation3 + $0x108] sm:$0xff] %v1925_v61  ;;  %2219 = vmatpush.bf16.msrb.mxu3 %v2640_v12  ;;  %2247 = vmatpush.bf16.msrb.mxu1 %v2644_v41  ;;  %v2544_v59 = vor.u32 %v2736_v25, %v2543_v24  ;;  %v2548_v17 = vor.u32 %v2734_v57, %v2545_v5 }
 0x2f4   : > { %v1599_v32 = vpop.permute.xlu0 %1598 }
 0x2f5   : > { %v1603_v7 = vrot.slane %v1599_v32, 4  ;;  %v2277_v32 = vld [vmem:[%s2924_s29 + $0x18] sm:$0xff] }
 0x2f7   : > { %v1606_v40 = vsel %vm449_vm13, %v1602_v39, %v1603_v7  ;;  %2220 = vmatpush.bf16.msrb.mxu3 %v2624_v43  ;;  %2248 = vmatpush.bf16.msrb.mxu1 %v2628_v44  ;;  %v2276_v7 = vld [vmem:[%s2924_s29 + $0x10] sm:$0xff] }
 0x2f8   : > { %v1607_v29 = vsel %vm3815_vm5, %v3673_v38, %v1606_v40  ;;  %v2575_v38 = vld [vmem:[#allocation3 + $0x48] sm:$0xf] }
 0x2f9   : > { %1611 = vst [vmem:[#allocation3 + $0x58] sm:$0xff] %v1607_v29  ;;  %v2682_v40 = vld [vmem:[%s2924_s29 + $0x28] sm:$0xff] }
 0x2fa   : > { %v2671_v33 = vld [vmem:[#allocation3 + $0x108] sm:$0xf]  ;;  %v2766_v2 = vld [vmem:[#allocation3 + $0x10c] sm:$0xf] }
 0x2fb   : > { %2221 = vmatpush.bf16.msrb.mxu3 %v2608_v22  ;;  %2249 = vmatpush.bf16.msrb.mxu1 %v2612_v50  ;;  %v2681_v50 = vld [vmem:[%s2924_s29 + $0x20] sm:$0xff] }
 0x2fc   : > { %v1919_v56 = vpop.permute.xlu0 %1918 }
 0x2fd   : > { %v1923_v0 = vrot.slane %v1919_v56, 4 }
 0x2ff   : > { %v1926_v9 = vsel %vm449_vm13, %v1922_v11, %v1923_v0  ;;  %2222 = vmatpush.bf16.msrb.mxu3 %v2592_v3  ;;  %2250 = vmatpush.bf16.msrb.mxu1 %v2596_v8  ;;  %v2683_v8 = vld [vmem:[%s2924_s29 + $0x30] sm:$0xff] }
 0x300   : > { %v1927_v28 = vsel %vm3816_vm3, %v1917_v52, %v1926_v9  ;;  %v2744_v13 = vld [vmem:[#allocation3 + $0x54] sm:$0xf0]  ;;  %v2577_v47 = vld [vmem:[#allocation3 + $0x58] sm:$0xf0] }
 0x301   : > { %1931 = vst [vmem:[#allocation3 + $0x118] sm:$0xff] %v1927_v28  ;;  %v2576_v15 = vor.u32 %v2744_v13, %v2575_v38  ;;  %v2580_v21 = vor.u32 %v2742_v14, %v2577_v47 }
 0x303   : > { %2223 = vmatpush.bf16.msrb.mxu3 %v2576_v15  ;;  %2251 = vmatpush.bf16.msrb.mxu1 %v2580_v21 }
 0x307   : > { %2224 = vmatpush.bf16.msrb.mxu3 %v2560_v1  ;;  %2252 = vmatpush.bf16.msrb.mxu1 %v2564_v20 }
 0x308   : > { %v2768_v27 = vld [vmem:[#allocation3 + $0x114] sm:$0xf0]  ;;  %v2673_v35 = vld [vmem:[#allocation3 + $0x118] sm:$0xf0] }
 0x309   : > { %v2672_v10 = vor.u32 %v2768_v27, %v2671_v33  ;;  %v2676_v31 = vor.u32 %v2766_v2, %v2673_v35 }
 0x30b   : > { %2225 = vmatpush.bf16.msrb.mxu3 %v2544_v59  ;;  %2239 = vmatpush.bf16.msrb.mxu2 %v2672_v10 }
 0x30c   : > { %2253 = vmatpush.bf16.msrb.mxu1 %v2548_v17  ;;  %2267 = vmatpush.bf16.msrb.mxu0 %v2676_v31 }
 0x30e   : > { %2226 = vmatmul.bf16.vlgmr.msrb.gmra.mxu3 %v3664_v4  ;;  %2679 = vmatmul.msk.bf16.vlgmr.msrb.gmra.mxu2 %vm512_vm8, %v3645_v36 }
 0x30f   : > { %2254 = vmatmul.bf16.vlgmr.msrb.gmra.mxu1 %v3664_v4  ;;  %2680 = vmatmul.msk.bf16.vlgmr.msrb.gmra.mxu0 %vm512_vm8, %v3645_v36  ;;  %v2274_v36 = vld [vmem:[%s2924_s29] sm:$0xff] }
 0x335   : > { %v2185_v26 = vpop.f32.mrf.mxu1 }
 0x33d   : > { %v2187_v60 = vpop.f32.mrf.mxu1 }
 0x342   : > { %v2199_v34 = vpop.f32.mrf.mxu0 }
 0x345   : > { %v2213_v53 = vpop.f32.mrf.mxu1 }
 0x346   : > { %v2214_v37 = vadd.f32 %v2213_v53, %v2199_v34 }
 0x347   : > { %v2171_v4 = vpop.f32.mrf.mxu2 }
 0x348   : > { %v2279_v61 = vadd.f32 %v2275_v42, %v2214_v37  ;;  %v2186_v12 = vadd.f32 %v2185_v26, %v2171_v4 }
 0x34a   : > { %2283 = vst [vmem:[%s3704_s26 + $0x8] sm:$0xff] %v2279_v61  ;;  %v2201_v41 = vpop.f32.mrf.mxu0  ;;  %v2278_v16 = vadd.f32 %v2274_v36, %v2186_v12 }
 0x34c   : > { %2282 = vst [vmem:[%s3704_s26] sm:$0xff] %v2278_v16 }
 0x34d   : > { %v2215_v30 = vpop.f32.mrf.mxu1 }
 0x34e   : > { %v2216_v18 = vadd.f32 %v2215_v30, %v2201_v41 }
 0x34f   : > { %v2173_v39 = vpop.f32.mrf.mxu2 }
 0x350   : > { %v2281_v51 = vadd.f32 %v2277_v32, %v2216_v18  ;;  %v2188_v43 = vadd.f32 %v2187_v60, %v2173_v39 }
 0x352   : > { %2285 = vst [vmem:[%s3704_s26 + $0x18] sm:$0xff] %v2281_v51  ;;  %v2280_v44 = vadd.f32 %v2276_v7, %v2188_v43 }
 0x354   : > { %2284 = vst [vmem:[%s3704_s26 + $0x10] sm:$0xff] %v2280_v44 }
 0x38c   : > { %v2255_v58 = vpop.f32.mrf.mxu1  ;;  %v2269_v62 = vpop.f32.mrf.mxu0 }
 0x38d   : > { %v2270_v29 = vadd.f32 %v2269_v62, %v2255_v58 }
 0x38f   : > { %v2292_v46 = vadd.f32 %v2682_v40, %v2270_v29 }
 0x391   : > { %v2227_v48 = vpop.f32.mrf.mxu3  ;;  %v2241_v22 = vpop.f32.mrf.mxu2  ;;  %2686 = vst [vmem:[%s3704_s26 + $0x28] sm:$0xff] %v2292_v46 }
 0x392   : > { %v2242_v52 = vadd.f32 %v2241_v22, %v2227_v48 }
 0x394   : > { %v2291_v49 = vadd.f32 %v2681_v50, %v2242_v52  ;;  %v2257_v23 = vpop.f32.mrf.mxu1  ;;  %v2271_v56 = vpop.f32.mrf.mxu0 }
 0x395   : > { %v2272_v55 = vadd.f32 %v2271_v56, %v2257_v23 }
 0x396   : > { %2685 = vst [vmem:[%s3704_s26 + $0x20] sm:$0xff] %v2291_v49 }
 0x397   : > { %v2294_v11 = vadd.f32 %v2684_v63, %v2272_v55 }
 0x399   : > { %v2229_v0 = vpop.f32.mrf.mxu3  ;;  %v2243_v3 = vpop.f32.mrf.mxu2  ;;  %2688 = vst [vmem:[%s3704_s26 + $0x38] sm:$0xff] %v2294_v11 }
 0x39a   : > { %v2244_v9 = vadd.f32 %v2243_v3, %v2229_v0 }
 0x39c   : > { %v2293_v38 = vadd.f32 %v2683_v8, %v2244_v9 }
 0x39e   : > { %2687 = vst [vmem:[%s3704_s26 + $0x30] sm:$0xff] %v2293_v38 }
 0x39f PF: > { %s18_s27 = sadd.s32 1, %s2795_s27  }
 0x3a0   : > { %p15_p4 = scmp.ge.s32.totalorder %s18_s27, 4  }
 0x3a2   :  { %17 = sbr.rel (!%p15_p4) target bundleno = 1 (0x1), region = 84 }

</bundles_post_ra>
